<compile_context>
chip_gen: v7x
topology: tpu7x:2x2x1
jax: 0.10.0
libtpu: 0.0.40
codegen_flags: <defaults>
</compile_context>

<pallas_src>
import jax
import jax.numpy as jnp
from jax import lax
from jax.experimental import pallas as pl
from jax.experimental.pallas import tpu as pltpu


# dot_general dims: contract the LAST dim of both operands, A(m,k) x B(n,k) -> (m,n)
_DN_RT = (((1,), (1,)), ((), ()))


# ---------------------------------------------------------------------------
# Fused kernel body
# ---------------------------------------------------------------------------
def _gcn_layer(h, adj_bd, wsrc_row, wcat, w2, bapp):
    """One GAT-style GCN layer over G graphs flattened to a (G*N, Fin) slab.

    h        : (GN, Fin)   node features (G graphs stacked row-wise)
    adj_bd   : (GN, GN)    block-diagonal 0/1 adjacency, adj[v, u] = 1 iff edge u -> v
    wsrc_row : (1, Fin)    attention weights for the edge-SOURCE features (row form)
    wcat     : (Fin, H+1)  [W_h | w_att_dst] : node-apply h-part fused with dst score
    w2       : (Fin, H)    node-apply weights for the aggregated 'hm' part
    bapp     : (1, H)      node-apply bias
    """
    f32 = jnp.float32
    fout = wcat.shape[1] - 1

    # Fused projection: node-apply h-part and destination attention score.
    proj = jnp.dot(h, wcat, preferred_element_type=f32)          # (GN, H+1)
    h_lin = proj[:, :fout]                                       # (GN, H)
    e_dst = proj[:, fout:fout + 1]                               # (GN, 1)

    # Source scores produced directly in ROW orientation (lane-major); the
    # (GN, GN) score matrix then needs only a VPU broadcast-add (the rank-1
    # ones @ e_src^T broadcast matmul of the previous version is gone).
    e_src = lax.dot_general(wsrc_row, h, _DN_RT,
                            preferred_element_type=f32)          # (1, GN)

    e = e_dst + e_src                                            # (GN, GN)
    e = jnp.where(e >= 0.0, e, 0.01 * e)                         # leaky_relu (0.01)

    # Masked softmax over incoming edges.  Block-diagonal adjacency keeps the
    # G graphs independent inside one flat (GN, GN) softmax / matmul.
    e_m = jnp.where(adj_bd > 0.0, e, -1e30)                      # -1e30 safe in f32
    e_max = jnp.max(e_m, axis=1, keepdims=True)
    w = jnp.exp(e_m - e_max) * adj_bd
    denom = jnp.sum(w, axis=1, keepdims=True)
    alpha = w / jnp.where(denom > 0.0, denom, 1.0)

    hm = jnp.dot(alpha, h, preferred_element_type=f32)           # (GN, Fin)

    # NodeApplyModule: relu(Linear(cat([h, hm], dim=1)))
    hn = h_lin + jnp.dot(hm, w2, preferred_element_type=f32) + bapp
    return jnp.maximum(hn, 0.0)


def acnet_kernel(x_ref, adj_ref,
                 wsrc1_ref, wcat1_ref, w21_ref, bapp1_ref,
                 wsrc2_ref, wcat2_ref, w22_ref, bapp2_ref,
                 wsrc3_ref, wcat3_ref, w23_ref, bapp3_ref,
                 wpv_ref, bpv_ref,
                 pi_ref, v_ref):
    f32 = jnp.float32
    h = x_ref[...]                     # (GN, Fin)  G graphs flattened per grid step
    adj = adj_ref[...]                 # (GN, GN)   block-diagonal 0/1

    # Three unrolled GCN layers; h never leaves the chip between layers.
    h = _gcn_layer(h, adj, wsrc1_ref[...], wcat1_ref[...], w21_ref[...], bapp1_ref[...])
    h = _gcn_layer(h, adj, wsrc2_ref[...], wcat2_ref[...], w22_ref[...], bapp2_ref[...])
    h = _gcn_layer(h, adj, wsrc3_ref[...], wcat3_ref[...], w23_ref[...], bapp3_ref[...])

    gn = h.shape[0]
    g = v_ref.shape[1]
    n = gn // g

    # Policy / value heads, computed row-major so both outputs are lane-dense
    # (1, GN) / (1, G) slabs: no width-1 masked stores, no relayout.
    pvh = lax.dot_general(wpv_ref[...], h, _DN_RT,
                          preferred_element_type=f32)            # (2, GN)
    pi_ref[...] = pvh[0:1, :] + bpv_ref[:, 0:1]                  # (1, GN)

    # dgl.mean_nodes: per-graph mean of per-node value scores via a 0/1
    # pooling matmul (the value head is affine, so mean commutes with it).
    row_g = lax.broadcasted_iota(jnp.int32, (g, gn), 0)
    col_u = lax.broadcasted_iota(jnp.int32, (g, gn), 1)
    base = row_g * n
    pool = jnp.where((col_u >= base) & (col_u < base + n), 1.0, 0.0)   # (G, GN)
    vsum = lax.dot_general(pvh[1:2, :], pool, _DN_RT,
                           preferred_element_type=f32)           # (1, G)
    v_ref[...] = vsum * (1.0 / n) + bpv_ref[:, 1:2]


# ---------------------------------------------------------------------------
# Wrappers
# ---------------------------------------------------------------------------
def _cost_estimate(steps, g, n, in_dim, hidden):
    gn = g * n

    def layer(fin, fout):
        return (2 * gn * fin * (fout + 1)      # h @ [W_h | w_dst]
                + 2 * gn * fin                 # src-score row
                + 10 * gn * gn                 # leaky_relu / mask / softmax VPU work
                + 2 * gn * gn * fin            # alpha @ h aggregation
                + 2 * gn * fin * fout          # hm @ W_hm
                + 3 * gn * fout)               # bias + add + relu

    flops = steps * (layer(in_dim, hidden) + 2 * layer(hidden, hidden)
                     + 4 * gn * hidden + 2 * gn * g + 2 * gn + 2 * g)
    transc = steps * 3 * gn * gn               # exp per layer
    bytes_acc = 4 * (steps * (gn * in_dim + gn * gn + gn + g)
                     + (in_dim * (hidden + 2) + in_dim * hidden + hidden)
                     + 2 * (hidden * (hidden + 2) + hidden * hidden + hidden)
                     + 2 * hidden + 2)
    return pl.CostEstimate(flops=int(flops), transcendentals=int(transc),
                           bytes_accessed=int(bytes_acc))


def acnet_forward_batched(x, adj, params, graphs_per_step=None, core_parallel=False):
    """x: (B, N, in_dim) f32, adj: (B, N, N) f32 (symmetric 0/1 adjacency).
    Returns (pi, v) with shapes (B, N, 1) and (B, 1, 1)."""
    b, n, in_dim = x.shape
    hidden = params["wpv"].shape[1]
    l1, l2, l3 = params["layers"]

    # G graphs per grid step: aim for G*N >= 128 lanes/sublanes of useful work.
    if graphs_per_step is None:
        graphs_per_step = max(1, 128 // n)
    g = max(1, min(graphs_per_step, b))
    steps = -(-b // g)
    b_pad = steps * g
    gn = g * n

    if b_pad != b:
        x = jnp.concatenate([x, jnp.zeros((b_pad - b, n, in_dim), x.dtype)], axis=0)
        adj = jnp.concatenate([adj, jnp.zeros((b_pad - b, n, n), adj.dtype)], axis=0)

    # Flatten G graphs into one (G*N, ...) slab per step; adjacency becomes
    # block-diagonal so ONE flat softmax / matmul covers all G graphs.
    x_steps = x.reshape(steps, gn, in_dim)
    adj5 = adj.reshape(steps, g, n, n)
    eye_g = jnp.eye(g, dtype=adj.dtype)
    adj_bd = jnp.einsum('sgvu,gh->sgvhu', adj5, eye_g).reshape(steps, gn, gn)

    weights = (l1["wsrc"], l1["wcat"], l1["w2"], l1["bapp"],
               l2["wsrc"], l2["wcat"], l2["w2"], l2["bapp"],
               l3["wsrc"], l3["wcat"], l3["w2"], l3["bapp"],
               params["wpv"], params["bpv"])

    in_specs = [
        pl.BlockSpec((None, gn, in_dim), lambda i: (i, 0, 0)),   # node slab / step
        pl.BlockSpec((None, gn, gn), lambda i: (i, 0, 0)),       # block-diag adj / step
    ]
    # Constant index_map -> weights are DMA'd once and stay VMEM-resident.
    in_specs += [pl.BlockSpec(w.shape, lambda i: (0, 0)) for w in weights]

    out_shape = (jax.ShapeDtypeStruct((steps, 1, gn), jnp.float32),   # PI slab
                 jax.ShapeDtypeStruct((steps, 1, g), jnp.float32))    # V slab
    out_specs = (pl.BlockSpec((None, 1, gn), lambda i: (i, 0, 0)),
                 pl.BlockSpec((None, 1, g), lambda i: (i, 0, 0)))

    if core_parallel:
        dim_sem = (pltpu.CORE_PARALLEL,)      # v7x: shard steps across both TCs
    else:
        dim_sem = ("parallel",)

    pi_slab, v_slab = pl.pallas_call(
        acnet_kernel,
        grid=(steps,),
        in_specs=in_specs,
        out_specs=out_specs,
        out_shape=out_shape,
        compiler_params=pltpu.CompilerParams(dimension_semantics=dim_sem),
        cost_estimate=_cost_estimate(steps, g, n, in_dim, hidden),
    )(x_steps, adj_bd, *weights)

    pi = pi_slab.reshape(b_pad, n, 1)[:b]
    v = v_slab.reshape(b_pad, 1, 1)[:b]
    return pi, v


def acnet_forward(x, adj, params):
    """Single-graph forward matching ACNet.forward: x (N, in_dim), adj (N, N).
    Returns PI (N, 1) and V (1, 1)."""
    pi, v = acnet_forward_batched(x[None], adj[None], params)
    return pi[0], v[0]


# ---------------------------------------------------------------------------
# Parameter init (PyTorch-Linear-style uniform(+-1/sqrt(fan_in)), deterministic)
# ---------------------------------------------------------------------------
def _linear_params(key, fan_in, fan_out, bias=True):
    kw, kb = jax.random.split(key)
    bound = 1.0 / jnp.sqrt(jnp.float32(fan_in))
    w_t = jax.random.uniform(kw, (fan_in, fan_out), jnp.float32, -bound, bound)
    if not bias:
        return w_t, None
    bvec = jax.random.uniform(kb, (1, fan_out), jnp.float32, -bound, bound)
    return w_t, bvec


def init_acnet_params(key, in_dim, hidden_dim):
    dims = [(in_dim, hidden_dim), (hidden_dim, hidden_dim), (hidden_dim, hidden_dim)]
    layers = []
    for fi, fo in dims:
        key, k_att, k_app = jax.random.split(key, 3)
        w_att, _ = _linear_params(k_att, 2 * fi, 1, bias=False)    # attn_fc (no bias)
        w_src = w_att[:fi, :]          # applies to edge-source features   (fi, 1)
        w_dst = w_att[fi:, :]          # applies to edge-destination feats (fi, 1)
        w_app, b_app = _linear_params(k_app, 2 * fi, fo)           # NodeApplyModule
        w1 = w_app[:fi, :]             # applies to h
        w2 = w_app[fi:, :]             # applies to hm
        layers.append(dict(
            wsrc=w_src.T,                                  # (1, fi)   row form
            wcat=jnp.concatenate([w1, w_dst], axis=1),     # (fi, fo+1)
            w2=w2,                                         # (fi, fo)
            bapp=b_app))                                   # (1, fo)
    key, k_pi, k_v = jax.random.split(key, 3)
    w_pi, b_pi = _linear_params(k_pi, hidden_dim, 1)               # self.policy
    w_v, b_v = _linear_params(k_v, hidden_dim, 1)                  # self.value
    wpv = jnp.concatenate([w_pi.T, w_v.T], axis=0)                 # (2, H) rows [pi; v]
    bpv = jnp.concatenate([b_pi, b_v], axis=1)                     # (1, 2)
    return dict(layers=layers, wpv=wpv, bpv=bpv)


# ---------------------------------------------------------------------------
# Pure-JAX reference (same masked-softmax formulation) for a single graph
# ---------------------------------------------------------------------------
def acnet_reference(x, adj, params):
    h = x
    for lyr in params["layers"]:
        wsrc, wcat, w2, bapp = lyr["wsrc"], lyr["wcat"], lyr["w2"], lyr["bapp"]
        fout = wcat.shape[1] - 1
        w1, wdst = wcat[:, :fout], wcat[:, fout:]
        e_src = h @ wsrc.T                      # (N, 1)
        e_dst = h @ wdst                        # (N, 1)
        e = e_dst + e_src.T                     # e[v, u] = e_dst[v] + e_src[u]
        e = jnp.where(e >= 0.0, e, 0.01 * e)
        e_m = jnp.where(adj > 0.0, e, -1e30)
        w = jnp.exp(e_m - jnp.max(e_m, axis=1, keepdims=True)) * adj
        den = jnp.sum(w, axis=1, keepdims=True)
        alpha = w / jnp.where(den > 0.0, den, 1.0)
        hm = alpha @ h
        h = jax.nn.relu(h @ w1 + hm @ w2 + bapp)
    wpv, bpv = params["wpv"], params["bpv"]
    pi = h @ wpv[0:1, :].T + bpv[:, 0:1]
    v = jnp.mean(h, axis=0, keepdims=True) @ wpv[1:2, :].T + bpv[:, 1:2]
    return pi, v


# ---------------------------------------------------------------------------
if __name__ == "__main__":
    B, N, IN_DIM, HIDDEN_DIM = 2, 8, 4, 32

    key = jax.random.PRNGKey(0)
    key, k_x = jax.random.split(key)
    x = jax.random.normal(k_x, (B, N, IN_DIM), jnp.float32)    # g.ndata['x'] per graph

    # Small bidirected graph: a ring over 8 nodes (symmetric 0/1 adjacency).
    eye = jnp.eye(N, dtype=jnp.float32)
    adj1 = jnp.roll(eye, 1, axis=1) + jnp.roll(eye, -1, axis=1)
    adj = jnp.stack([adj1, adj1], axis=0)

    params = init_acnet_params(key, IN_DIM, HIDDEN_DIM)

    # Batched fused forward: all graphs in one grid step (one pallas_call).
    pi_b, v_b = acnet_forward_batched(x, adj, params)
    jax.block_until_ready((pi_b, v_b))
    assert pi_b.shape == (B, N, 1) and v_b.shape == (B, 1, 1)

    # Single-graph path matching the original per-graph ACNet.forward API.
    pi0, v0 = acnet_forward(x[0], adj[0], params)
    jax.block_until_ready((pi0, v0))
    assert pi0.shape == (N, 1) and v0.shape == (1, 1)

    # Numerics vs. pure-JAX reference.
    for bi in range(B):
        pi_r, v_r = acnet_reference(x[bi], adj[bi], params)
        assert float(jnp.max(jnp.abs(pi_b[bi] - pi_r))) < 1e-3
        assert float(jnp.abs(v_b[bi, 0, 0] - v_r[0, 0])) < 1e-3

    print("KERNEL_OK")
</pallas_src>

<mosaic_0001>
module attributes {stable_mosaic.version = 11 : i64} {
  func.func @acnet_kernel(%arg0: i32, %arg1: memref<1x16x4xf32, #tpu.memory_space<vmem>>, %arg2: memref<1x16x16xf32, #tpu.memory_space<vmem>>, %arg3: memref<1x4xf32, #tpu.memory_space<vmem>>, %arg4: memref<4x33xf32, #tpu.memory_space<vmem>>, %arg5: memref<4x32xf32, #tpu.memory_space<vmem>>, %arg6: memref<1x32xf32, #tpu.memory_space<vmem>>, %arg7: memref<1x32xf32, #tpu.memory_space<vmem>>, %arg8: memref<32x33xf32, #tpu.memory_space<vmem>>, %arg9: memref<32x32xf32, #tpu.memory_space<vmem>>, %arg10: memref<1x32xf32, #tpu.memory_space<vmem>>, %arg11: memref<1x32xf32, #tpu.memory_space<vmem>>, %arg12: memref<32x33xf32, #tpu.memory_space<vmem>>, %arg13: memref<32x32xf32, #tpu.memory_space<vmem>>, %arg14: memref<1x32xf32, #tpu.memory_space<vmem>>, %arg15: memref<2x32xf32, #tpu.memory_space<vmem>>, %arg16: memref<1x2xf32, #tpu.memory_space<vmem>>, %arg17: memref<1x1x16xf32, #tpu.memory_space<vmem>>, %arg18: memref<1x1x2xf32, #tpu.memory_space<vmem>>) attributes {dimension_semantics = [#tpu.dimension_semantics<parallel>], iteration_bounds = array<i64: 1>, scalar_prefetch = 0 : i64, scratch_operands = 0 : i64, tpu.core_type = #tpu.core_type<tc>, window_params = [{transform_indices = @transform_0, window_bounds = array<i64: 1, 16, 4>}, {transform_indices = @transform_1, window_bounds = array<i64: 1, 16, 16>}, {pipeline_mode = #tpu.pipeline_mode<synchronous>, transform_indices = @transform_2, window_bounds = array<i64: 1, 4>}, {pipeline_mode = #tpu.pipeline_mode<synchronous>, transform_indices = @transform_3, window_bounds = array<i64: 4, 33>}, {pipeline_mode = #tpu.pipeline_mode<synchronous>, transform_indices = @transform_4, window_bounds = array<i64: 4, 32>}, {pipeline_mode = #tpu.pipeline_mode<synchronous>, transform_indices = @transform_5, window_bounds = array<i64: 1, 32>}, {pipeline_mode = #tpu.pipeline_mode<synchronous>, transform_indices = @transform_6, window_bounds = array<i64: 1, 32>}, {pipeline_mode = #tpu.pipeline_mode<synchronous>, transform_indices = @transform_7, window_bounds = array<i64: 32, 33>}, {pipeline_mode = #tpu.pipeline_mode<synchronous>, transform_indices = @transform_8, window_bounds = array<i64: 32, 32>}, {pipeline_mode = #tpu.pipeline_mode<synchronous>, transform_indices = @transform_9, window_bounds = array<i64: 1, 32>}, {pipeline_mode = #tpu.pipeline_mode<synchronous>, transform_indices = @transform_10, window_bounds = array<i64: 1, 32>}, {pipeline_mode = #tpu.pipeline_mode<synchronous>, transform_indices = @transform_11, window_bounds = array<i64: 32, 33>}, {pipeline_mode = #tpu.pipeline_mode<synchronous>, transform_indices = @transform_12, window_bounds = array<i64: 32, 32>}, {pipeline_mode = #tpu.pipeline_mode<synchronous>, transform_indices = @transform_13, window_bounds = array<i64: 1, 32>}, {pipeline_mode = #tpu.pipeline_mode<synchronous>, transform_indices = @transform_14, window_bounds = array<i64: 2, 32>}, {pipeline_mode = #tpu.pipeline_mode<synchronous>, transform_indices = @transform_15, window_bounds = array<i64: 1, 2>}, {transform_indices = @transform_16, window_bounds = array<i64: 1, 1, 16>}, {transform_indices = @transform_17, window_bounds = array<i64: 1, 1, 2>}]} {
    %c0 = arith.constant 0 : index
    %c0_0 = arith.constant 0 : index
    %c0_1 = arith.constant 0 : index
    %0 = vector.load %arg1[%c0, %c0_0, %c0_1] : memref<1x16x4xf32, #tpu.memory_space<vmem>>, vector<1x16x4xf32>
    %1 = vector.shape_cast %0 : vector<1x16x4xf32> to vector<16x4xf32>
    %c0_2 = arith.constant 0 : index
    %c0_3 = arith.constant 0 : index
    %c0_4 = arith.constant 0 : index
    %2 = vector.load %arg2[%c0_2, %c0_3, %c0_4] : memref<1x16x16xf32, #tpu.memory_space<vmem>>, vector<1x16x16xf32>
    %3 = vector.shape_cast %2 : vector<1x16x16xf32> to vector<16x16xf32>
    %c0_5 = arith.constant 0 : index
    %c0_6 = arith.constant 0 : index
    %4 = vector.load %arg3[%c0_5, %c0_6] : memref<1x4xf32, #tpu.memory_space<vmem>>, vector<1x4xf32>
    %c0_7 = arith.constant 0 : index
    %c0_8 = arith.constant 0 : index
    %5 = vector.load %arg4[%c0_7, %c0_8] : memref<4x33xf32, #tpu.memory_space<vmem>>, vector<4x33xf32>
    %c0_9 = arith.constant 0 : index
    %c0_10 = arith.constant 0 : index
    %6 = vector.load %arg5[%c0_9, %c0_10] : memref<4x32xf32, #tpu.memory_space<vmem>>, vector<4x32xf32>
    %c0_11 = arith.constant 0 : index
    %c0_12 = arith.constant 0 : index
    %7 = vector.load %arg6[%c0_11, %c0_12] : memref<1x32xf32, #tpu.memory_space<vmem>>, vector<1x32xf32>
    %cst = arith.constant dense<0.000000e+00> : vector<16x33xf32>
    %8 = tpu.matmul %1, %5, %cst {dimension_numbers = #tpu.dot_dimension_numbers<[1], [0], [0], [1], [0, 0, 1, 1], [], []>} : vector<16x4xf32>, vector<4x33xf32>, vector<16x33xf32> -> vector<16x33xf32>
    %9 = vector.extract_strided_slice %8 {offsets = [0, 0], sizes = [16, 32], strides = [1, 1]} : vector<16x33xf32> to vector<16x32xf32>
    %10 = vector.extract_strided_slice %8 {offsets = [0, 32], sizes = [16, 1], strides = [1, 1]} : vector<16x33xf32> to vector<16x1xf32>
    %cst_13 = arith.constant dense<0.000000e+00> : vector<1x16xf32>
    %11 = tpu.matmul %4, %1, %cst_13 {dimension_numbers = #tpu.dot_dimension_numbers<[1], [1], [0], [0], [0, 0, 1, 0], [], []>} : vector<1x4xf32>, vector<16x4xf32>, vector<1x16xf32> -> vector<1x16xf32>
    %12 = vector.broadcast %10 : vector<16x1xf32> to vector<16x16xf32>
    %13 = vector.broadcast %11 : vector<1x16xf32> to vector<16x16xf32>
    %14 = arith.addf %12, %13 : vector<16x16xf32>
    %cst_14 = arith.constant 0.000000e+00 : f32
    %15 = vector.broadcast %cst_14 : f32 to vector<16x16xf32>
    %16 = arith.cmpf oge, %14, %15 : vector<16x16xf32>
    %cst_15 = arith.constant 0.00999999977 : f32
    %17 = vector.broadcast %cst_15 : f32 to vector<16x16xf32>
    %18 = arith.mulf %17, %14 : vector<16x16xf32>
    %19 = arith.select %16, %14, %18 : vector<16x16xi1>, vector<16x16xf32>
    %cst_16 = arith.constant 0.000000e+00 : f32
    %20 = vector.broadcast %cst_16 : f32 to vector<16x16xf32>
    %21 = arith.cmpf ogt, %3, %20 : vector<16x16xf32>
    %cst_17 = arith.constant -1.000000e+30 : f32
    %22 = vector.broadcast %cst_17 : f32 to vector<16x16xf32>
    %23 = arith.select %21, %19, %22 : vector<16x16xi1>, vector<16x16xf32>
    %cst_18 = arith.constant dense<0xFF800000> : vector<16xf32>
    %24 = vector.multi_reduction <maximumf>, %23, %cst_18 [1] : vector<16x16xf32> to vector<16xf32>
    %25 = vector.shape_cast %24 : vector<16xf32> to vector<16x1xf32>
    %26 = vector.broadcast %25 : vector<16x1xf32> to vector<16x16xf32>
    %27 = arith.subf %23, %26 : vector<16x16xf32>
    %28 = math.exp %27 : vector<16x16xf32>
    %29 = arith.mulf %28, %3 : vector<16x16xf32>
    %cst_19 = arith.constant dense<0.000000e+00> : vector<16xf32>
    %30 = vector.multi_reduction <add>, %29, %cst_19 [1] : vector<16x16xf32> to vector<16xf32>
    %31 = vector.shape_cast %30 : vector<16xf32> to vector<16x1xf32>
    %cst_20 = arith.constant 0.000000e+00 : f32
    %32 = vector.broadcast %cst_20 : f32 to vector<16x1xf32>
    %33 = arith.cmpf ogt, %31, %32 : vector<16x1xf32>
    %cst_21 = arith.constant 1.000000e+00 : f32
    %34 = vector.broadcast %cst_21 : f32 to vector<16x1xf32>
    %35 = arith.select %33, %31, %34 : vector<16x1xi1>, vector<16x1xf32>
    %36 = vector.broadcast %35 : vector<16x1xf32> to vector<16x16xf32>
    %37 = arith.divf %29, %36 : vector<16x16xf32>
    %cst_22 = arith.constant dense<0.000000e+00> : vector<16x4xf32>
    %38 = tpu.matmul %37, %1, %cst_22 {dimension_numbers = #tpu.dot_dimension_numbers<[1], [0], [0], [1], [0, 0, 1, 1], [], []>} : vector<16x16xf32>, vector<16x4xf32>, vector<16x4xf32> -> vector<16x4xf32>
    %cst_23 = arith.constant dense<0.000000e+00> : vector<16x32xf32>
    %39 = tpu.matmul %38, %6, %cst_23 {dimension_numbers = #tpu.dot_dimension_numbers<[1], [0], [0], [1], [0, 0, 1, 1], [], []>} : vector<16x4xf32>, vector<4x32xf32>, vector<16x32xf32> -> vector<16x32xf32>
    %40 = arith.addf %9, %39 : vector<16x32xf32>
    %41 = vector.broadcast %7 : vector<1x32xf32> to vector<16x32xf32>
    %42 = arith.addf %40, %41 : vector<16x32xf32>
    %cst_24 = arith.constant 0.000000e+00 : f32
    %43 = vector.broadcast %cst_24 : f32 to vector<16x32xf32>
    %44 = arith.maximumf %42, %43 : vector<16x32xf32>
    %c0_25 = arith.constant 0 : index
    %c0_26 = arith.constant 0 : index
    %45 = vector.load %arg7[%c0_25, %c0_26] : memref<1x32xf32, #tpu.memory_space<vmem>>, vector<1x32xf32>
    %c0_27 = arith.constant 0 : index
    %c0_28 = arith.constant 0 : index
    %46 = vector.load %arg8[%c0_27, %c0_28] : memref<32x33xf32, #tpu.memory_space<vmem>>, vector<32x33xf32>
    %c0_29 = arith.constant 0 : index
    %c0_30 = arith.constant 0 : index
    %47 = vector.load %arg9[%c0_29, %c0_30] : memref<32x32xf32, #tpu.memory_space<vmem>>, vector<32x32xf32>
    %c0_31 = arith.constant 0 : index
    %c0_32 = arith.constant 0 : index
    %48 = vector.load %arg10[%c0_31, %c0_32] : memref<1x32xf32, #tpu.memory_space<vmem>>, vector<1x32xf32>
    %cst_33 = arith.constant dense<0.000000e+00> : vector<16x33xf32>
    %49 = tpu.matmul %44, %46, %cst_33 {dimension_numbers = #tpu.dot_dimension_numbers<[1], [0], [0], [1], [0, 0, 1, 1], [], []>} : vector<16x32xf32>, vector<32x33xf32>, vector<16x33xf32> -> vector<16x33xf32>
    %50 = vector.extract_strided_slice %49 {offsets = [0, 0], sizes = [16, 32], strides = [1, 1]} : vector<16x33xf32> to vector<16x32xf32>
    %51 = vector.extract_strided_slice %49 {offsets = [0, 32], sizes = [16, 1], strides = [1, 1]} : vector<16x33xf32> to vector<16x1xf32>
    %cst_34 = arith.constant dense<0.000000e+00> : vector<1x16xf32>
    %52 = tpu.matmul %45, %44, %cst_34 {dimension_numbers = #tpu.dot_dimension_numbers<[1], [1], [0], [0], [0, 0, 1, 0], [], []>} : vector<1x32xf32>, vector<16x32xf32>, vector<1x16xf32> -> vector<1x16xf32>
    %53 = vector.broadcast %51 : vector<16x1xf32> to vector<16x16xf32>
    %54 = vector.broadcast %52 : vector<1x16xf32> to vector<16x16xf32>
    %55 = arith.addf %53, %54 : vector<16x16xf32>
    %cst_35 = arith.constant 0.000000e+00 : f32
    %56 = vector.broadcast %cst_35 : f32 to vector<16x16xf32>
    %57 = arith.cmpf oge, %55, %56 : vector<16x16xf32>
    %cst_36 = arith.constant 0.00999999977 : f32
    %58 = vector.broadcast %cst_36 : f32 to vector<16x16xf32>
    %59 = arith.mulf %58, %55 : vector<16x16xf32>
    %60 = arith.select %57, %55, %59 : vector<16x16xi1>, vector<16x16xf32>
    %cst_37 = arith.constant 0.000000e+00 : f32
    %61 = vector.broadcast %cst_37 : f32 to vector<16x16xf32>
    %62 = arith.cmpf ogt, %3, %61 : vector<16x16xf32>
    %cst_38 = arith.constant -1.000000e+30 : f32
    %63 = vector.broadcast %cst_38 : f32 to vector<16x16xf32>
    %64 = arith.select %62, %60, %63 : vector<16x16xi1>, vector<16x16xf32>
    %cst_39 = arith.constant dense<0xFF800000> : vector<16xf32>
    %65 = vector.multi_reduction <maximumf>, %64, %cst_39 [1] : vector<16x16xf32> to vector<16xf32>
    %66 = vector.shape_cast %65 : vector<16xf32> to vector<16x1xf32>
    %67 = vector.broadcast %66 : vector<16x1xf32> to vector<16x16xf32>
    %68 = arith.subf %64, %67 : vector<16x16xf32>
    %69 = math.exp %68 : vector<16x16xf32>
    %70 = arith.mulf %69, %3 : vector<16x16xf32>
    %cst_40 = arith.constant dense<0.000000e+00> : vector<16xf32>
    %71 = vector.multi_reduction <add>, %70, %cst_40 [1] : vector<16x16xf32> to vector<16xf32>
    %72 = vector.shape_cast %71 : vector<16xf32> to vector<16x1xf32>
    %cst_41 = arith.constant 0.000000e+00 : f32
    %73 = vector.broadcast %cst_41 : f32 to vector<16x1xf32>
    %74 = arith.cmpf ogt, %72, %73 : vector<16x1xf32>
    %cst_42 = arith.constant 1.000000e+00 : f32
    %75 = vector.broadcast %cst_42 : f32 to vector<16x1xf32>
    %76 = arith.select %74, %72, %75 : vector<16x1xi1>, vector<16x1xf32>
    %77 = vector.broadcast %76 : vector<16x1xf32> to vector<16x16xf32>
    %78 = arith.divf %70, %77 : vector<16x16xf32>
    %cst_43 = arith.constant dense<0.000000e+00> : vector<16x32xf32>
    %79 = tpu.matmul %78, %44, %cst_43 {dimension_numbers = #tpu.dot_dimension_numbers<[1], [0], [0], [1], [0, 0, 1, 1], [], []>} : vector<16x16xf32>, vector<16x32xf32>, vector<16x32xf32> -> vector<16x32xf32>
    %cst_44 = arith.constant dense<0.000000e+00> : vector<16x32xf32>
    %80 = tpu.matmul %79, %47, %cst_44 {dimension_numbers = #tpu.dot_dimension_numbers<[1], [0], [0], [1], [0, 0, 1, 1], [], []>} : vector<16x32xf32>, vector<32x32xf32>, vector<16x32xf32> -> vector<16x32xf32>
    %81 = arith.addf %50, %80 : vector<16x32xf32>
    %82 = vector.broadcast %48 : vector<1x32xf32> to vector<16x32xf32>
    %83 = arith.addf %81, %82 : vector<16x32xf32>
    %cst_45 = arith.constant 0.000000e+00 : f32
    %84 = vector.broadcast %cst_45 : f32 to vector<16x32xf32>
    %85 = arith.maximumf %83, %84 : vector<16x32xf32>
    %c0_46 = arith.constant 0 : index
    %c0_47 = arith.constant 0 : index
    %86 = vector.load %arg11[%c0_46, %c0_47] : memref<1x32xf32, #tpu.memory_space<vmem>>, vector<1x32xf32>
    %c0_48 = arith.constant 0 : index
    %c0_49 = arith.constant 0 : index
    %87 = vector.load %arg12[%c0_48, %c0_49] : memref<32x33xf32, #tpu.memory_space<vmem>>, vector<32x33xf32>
    %c0_50 = arith.constant 0 : index
    %c0_51 = arith.constant 0 : index
    %88 = vector.load %arg13[%c0_50, %c0_51] : memref<32x32xf32, #tpu.memory_space<vmem>>, vector<32x32xf32>
    %c0_52 = arith.constant 0 : index
    %c0_53 = arith.constant 0 : index
    %89 = vector.load %arg14[%c0_52, %c0_53] : memref<1x32xf32, #tpu.memory_space<vmem>>, vector<1x32xf32>
    %cst_54 = arith.constant dense<0.000000e+00> : vector<16x33xf32>
    %90 = tpu.matmul %85, %87, %cst_54 {dimension_numbers = #tpu.dot_dimension_numbers<[1], [0], [0], [1], [0, 0, 1, 1], [], []>} : vector<16x32xf32>, vector<32x33xf32>, vector<16x33xf32> -> vector<16x33xf32>
    %91 = vector.extract_strided_slice %90 {offsets = [0, 0], sizes = [16, 32], strides = [1, 1]} : vector<16x33xf32> to vector<16x32xf32>
    %92 = vector.extract_strided_slice %90 {offsets = [0, 32], sizes = [16, 1], strides = [1, 1]} : vector<16x33xf32> to vector<16x1xf32>
    %cst_55 = arith.constant dense<0.000000e+00> : vector<1x16xf32>
    %93 = tpu.matmul %86, %85, %cst_55 {dimension_numbers = #tpu.dot_dimension_numbers<[1], [1], [0], [0], [0, 0, 1, 0], [], []>} : vector<1x32xf32>, vector<16x32xf32>, vector<1x16xf32> -> vector<1x16xf32>
    %94 = vector.broadcast %92 : vector<16x1xf32> to vector<16x16xf32>
    %95 = vector.broadcast %93 : vector<1x16xf32> to vector<16x16xf32>
    %96 = arith.addf %94, %95 : vector<16x16xf32>
    %cst_56 = arith.constant 0.000000e+00 : f32
    %97 = vector.broadcast %cst_56 : f32 to vector<16x16xf32>
    %98 = arith.cmpf oge, %96, %97 : vector<16x16xf32>
    %cst_57 = arith.constant 0.00999999977 : f32
    %99 = vector.broadcast %cst_57 : f32 to vector<16x16xf32>
    %100 = arith.mulf %99, %96 : vector<16x16xf32>
    %101 = arith.select %98, %96, %100 : vector<16x16xi1>, vector<16x16xf32>
    %cst_58 = arith.constant 0.000000e+00 : f32
    %102 = vector.broadcast %cst_58 : f32 to vector<16x16xf32>
    %103 = arith.cmpf ogt, %3, %102 : vector<16x16xf32>
    %cst_59 = arith.constant -1.000000e+30 : f32
    %104 = vector.broadcast %cst_59 : f32 to vector<16x16xf32>
    %105 = arith.select %103, %101, %104 : vector<16x16xi1>, vector<16x16xf32>
    %cst_60 = arith.constant dense<0xFF800000> : vector<16xf32>
    %106 = vector.multi_reduction <maximumf>, %105, %cst_60 [1] : vector<16x16xf32> to vector<16xf32>
    %107 = vector.shape_cast %106 : vector<16xf32> to vector<16x1xf32>
    %108 = vector.broadcast %107 : vector<16x1xf32> to vector<16x16xf32>
    %109 = arith.subf %105, %108 : vector<16x16xf32>
    %110 = math.exp %109 : vector<16x16xf32>
    %111 = arith.mulf %110, %3 : vector<16x16xf32>
    %cst_61 = arith.constant dense<0.000000e+00> : vector<16xf32>
    %112 = vector.multi_reduction <add>, %111, %cst_61 [1] : vector<16x16xf32> to vector<16xf32>
    %113 = vector.shape_cast %112 : vector<16xf32> to vector<16x1xf32>
    %cst_62 = arith.constant 0.000000e+00 : f32
    %114 = vector.broadcast %cst_62 : f32 to vector<16x1xf32>
    %115 = arith.cmpf ogt, %113, %114 : vector<16x1xf32>
    %cst_63 = arith.constant 1.000000e+00 : f32
    %116 = vector.broadcast %cst_63 : f32 to vector<16x1xf32>
    %117 = arith.select %115, %113, %116 : vector<16x1xi1>, vector<16x1xf32>
    %118 = vector.broadcast %117 : vector<16x1xf32> to vector<16x16xf32>
    %119 = arith.divf %111, %118 : vector<16x16xf32>
    %cst_64 = arith.constant dense<0.000000e+00> : vector<16x32xf32>
    %120 = tpu.matmul %119, %85, %cst_64 {dimension_numbers = #tpu.dot_dimension_numbers<[1], [0], [0], [1], [0, 0, 1, 1], [], []>} : vector<16x16xf32>, vector<16x32xf32>, vector<16x32xf32> -> vector<16x32xf32>
    %cst_65 = arith.constant dense<0.000000e+00> : vector<16x32xf32>
    %121 = tpu.matmul %120, %88, %cst_65 {dimension_numbers = #tpu.dot_dimension_numbers<[1], [0], [0], [1], [0, 0, 1, 1], [], []>} : vector<16x32xf32>, vector<32x32xf32>, vector<16x32xf32> -> vector<16x32xf32>
    %122 = arith.addf %91, %121 : vector<16x32xf32>
    %123 = vector.broadcast %89 : vector<1x32xf32> to vector<16x32xf32>
    %124 = arith.addf %122, %123 : vector<16x32xf32>
    %cst_66 = arith.constant 0.000000e+00 : f32
    %125 = vector.broadcast %cst_66 : f32 to vector<16x32xf32>
    %126 = arith.maximumf %124, %125 : vector<16x32xf32>
    %c0_67 = arith.constant 0 : index
    %c0_68 = arith.constant 0 : index
    %127 = vector.load %arg15[%c0_67, %c0_68] : memref<2x32xf32, #tpu.memory_space<vmem>>, vector<2x32xf32>
    %cst_69 = arith.constant dense<0.000000e+00> : vector<2x16xf32>
    %128 = tpu.matmul %127, %126, %cst_69 {dimension_numbers = #tpu.dot_dimension_numbers<[1], [1], [0], [0], [0, 0, 1, 0], [], []>} : vector<2x32xf32>, vector<16x32xf32>, vector<2x16xf32> -> vector<2x16xf32>
    %129 = vector.extract_strided_slice %128 {offsets = [0, 0], sizes = [1, 16], strides = [1, 1]} : vector<2x16xf32> to vector<1x16xf32>
    %c0_70 = arith.constant 0 : index
    %c0_71 = arith.constant 0 : index
    %130 = vector.load %arg16[%c0_70, %c0_71] : memref<1x2xf32, #tpu.memory_space<vmem>>, vector<1x1xf32>
    %131 = vector.broadcast %130 : vector<1x1xf32> to vector<1x16xf32>
    %132 = arith.addf %129, %131 : vector<1x16xf32>
    %c0_72 = arith.constant 0 : index
    %c0_73 = arith.constant 0 : index
    %c0_74 = arith.constant 0 : index
    %133 = vector.load %arg17[%c0_72, %c0_73, %c0_74] : memref<1x1x16xf32, #tpu.memory_space<vmem>>, vector<1x1x16xf32>
    %134 = vector.shape_cast %133 : vector<1x1x16xf32> to vector<1x16xf32>
    %135 = vector.shape_cast %132 : vector<1x16xf32> to vector<1x1x16xf32>
    tpu.vector_store %arg17[%c0_72, %c0_73, %c0_74], %135 {strides = array<i32>} : memref<1x1x16xf32, #tpu.memory_space<vmem>>, vector<1x1x16xf32>,
    %136 = tpu.iota {dimensions = array<i32: 0>} : vector<2x16xi32>
    %137 = tpu.iota {dimensions = array<i32: 1>} : vector<2x16xi32>
    %c8_i32 = arith.constant 8 : i32
    %138 = vector.broadcast %c8_i32 : i32 to vector<2x16xi32>
    %139 = arith.muli %136, %138 : vector<2x16xi32>
    %140 = arith.cmpi sge, %137, %139 : vector<2x16xi32>
    %c8_i32_75 = arith.constant 8 : i32
    %141 = vector.broadcast %c8_i32_75 : i32 to vector<2x16xi32>
    %142 = arith.addi %139, %141 : vector<2x16xi32>
    %143 = arith.cmpi slt, %137, %142 : vector<2x16xi32>
    %144 = arith.andi %140, %143 : vector<2x16xi1>
    %cst_76 = arith.constant 1.000000e+00 : f32
    %cst_77 = arith.constant 0.000000e+00 : f32
    %145 = vector.broadcast %cst_76 : f32 to vector<2x16xf32>
    %146 = vector.broadcast %cst_77 : f32 to vector<2x16xf32>
    %147 = arith.select %144, %145, %146 : vector<2x16xi1>, vector<2x16xf32>
    %148 = vector.extract_strided_slice %128 {offsets = [1, 0], sizes = [1, 16], strides = [1, 1]} : vector<2x16xf32> to vector<1x16xf32>
    %cst_78 = arith.constant dense<0.000000e+00> : vector<1x2xf32>
    %149 = tpu.matmul %148, %147, %cst_78 {dimension_numbers = #tpu.dot_dimension_numbers<[1], [1], [0], [0], [0, 0, 1, 0], [], []>} : vector<1x16xf32>, vector<2x16xf32>, vector<1x2xf32> -> vector<1x2xf32>
    %cst_79 = arith.constant 1.250000e-01 : f32
    %150 = vector.broadcast %cst_79 : f32 to vector<1x2xf32>
    %151 = arith.mulf %149, %150 : vector<1x2xf32>
    %c0_80 = arith.constant 0 : index
    %c1 = arith.constant 1 : index
    %152 = vector.load %arg16[%c0_80, %c1] : memref<1x2xf32, #tpu.memory_space<vmem>>, vector<1x1xf32>
    %153 = vector.broadcast %152 : vector<1x1xf32> to vector<1x2xf32>
    %154 = arith.addf %151, %153 : vector<1x2xf32>
    %c0_81 = arith.constant 0 : index
    %c0_82 = arith.constant 0 : index
    %c0_83 = arith.constant 0 : index
    %155 = vector.load %arg18[%c0_81, %c0_82, %c0_83] : memref<1x1x2xf32, #tpu.memory_space<vmem>>, vector<1x1x2xf32>
    %156 = vector.shape_cast %155 : vector<1x1x2xf32> to vector<1x2xf32>
    %157 = vector.shape_cast %154 : vector<1x2xf32> to vector<1x1x2xf32>
    tpu.vector_store %arg18[%c0_81, %c0_82, %c0_83], %157 {strides = array<i32>} : memref<1x1x2xf32, #tpu.memory_space<vmem>>, vector<1x1x2xf32>,
    return
  }
  func.func @transform_0(%arg0: i32) -> (i32, i32, i32) {
    %c0_i32 = arith.constant 0 : i32
    %c0_i32_0 = arith.constant 0 : i32
    %c0_i32_1 = arith.constant 0 : i32
    return %arg0, %c0_i32, %c0_i32_0 : i32, i32, i32
  }
  func.func @transform_1(%arg0: i32) -> (i32, i32, i32) {
    %c0_i32 = arith.constant 0 : i32
    %c0_i32_0 = arith.constant 0 : i32
    %c0_i32_1 = arith.constant 0 : i32
    return %arg0, %c0_i32, %c0_i32_0 : i32, i32, i32
  }
  func.func @transform_2(%arg0: i32) -> (i32, i32) {
    %c0_i32 = arith.constant 0 : i32
    %c0_i32_0 = arith.constant 0 : i32
    %c0_i32_1 = arith.constant 0 : i32
    return %c0_i32, %c0_i32_0 : i32, i32
  }
  func.func @transform_3(%arg0: i32) -> (i32, i32) {
    %c0_i32 = arith.constant 0 : i32
    %c0_i32_0 = arith.constant 0 : i32
    %c0_i32_1 = arith.constant 0 : i32
    return %c0_i32, %c0_i32_0 : i32, i32
  }
  func.func @transform_4(%arg0: i32) -> (i32, i32) {
    %c0_i32 = arith.constant 0 : i32
    %c0_i32_0 = arith.constant 0 : i32
    %c0_i32_1 = arith.constant 0 : i32
    return %c0_i32, %c0_i32_0 : i32, i32
  }
  func.func @transform_5(%arg0: i32) -> (i32, i32) {
    %c0_i32 = arith.constant 0 : i32
    %c0_i32_0 = arith.constant 0 : i32
    %c0_i32_1 = arith.constant 0 : i32
    return %c0_i32, %c0_i32_0 : i32, i32
  }
  func.func @transform_6(%arg0: i32) -> (i32, i32) {
    %c0_i32 = arith.constant 0 : i32
    %c0_i32_0 = arith.constant 0 : i32
    %c0_i32_1 = arith.constant 0 : i32
    return %c0_i32, %c0_i32_0 : i32, i32
  }
  func.func @transform_7(%arg0: i32) -> (i32, i32) {
    %c0_i32 = arith.constant 0 : i32
    %c0_i32_0 = arith.constant 0 : i32
    %c0_i32_1 = arith.constant 0 : i32
    return %c0_i32, %c0_i32_0 : i32, i32
  }
  func.func @transform_8(%arg0: i32) -> (i32, i32) {
    %c0_i32 = arith.constant 0 : i32
    %c0_i32_0 = arith.constant 0 : i32
    %c0_i32_1 = arith.constant 0 : i32
    return %c0_i32, %c0_i32_0 : i32, i32
  }
  func.func @transform_9(%arg0: i32) -> (i32, i32) {
    %c0_i32 = arith.constant 0 : i32
    %c0_i32_0 = arith.constant 0 : i32
    %c0_i32_1 = arith.constant 0 : i32
    return %c0_i32, %c0_i32_0 : i32, i32
  }
  func.func @transform_10(%arg0: i32) -> (i32, i32) {
    %c0_i32 = arith.constant 0 : i32
    %c0_i32_0 = arith.constant 0 : i32
    %c0_i32_1 = arith.constant 0 : i32
    return %c0_i32, %c0_i32_0 : i32, i32
  }
  func.func @transform_11(%arg0: i32) -> (i32, i32) {
    %c0_i32 = arith.constant 0 : i32
    %c0_i32_0 = arith.constant 0 : i32
    %c0_i32_1 = arith.constant 0 : i32
    return %c0_i32, %c0_i32_0 : i32, i32
  }
  func.func @transform_12(%arg0: i32) -> (i32, i32) {
    %c0_i32 = arith.constant 0 : i32
    %c0_i32_0 = arith.constant 0 : i32
    %c0_i32_1 = arith.constant 0 : i32
    return %c0_i32, %c0_i32_0 : i32, i32
  }
  func.func @transform_13(%arg0: i32) -> (i32, i32) {
    %c0_i32 = arith.constant 0 : i32
    %c0_i32_0 = arith.constant 0 : i32
    %c0_i32_1 = arith.constant 0 : i32
    return %c0_i32, %c0_i32_0 : i32, i32
  }
  func.func @transform_14(%arg0: i32) -> (i32, i32) {
    %c0_i32 = arith.constant 0 : i32
    %c0_i32_0 = arith.constant 0 : i32
    %c0_i32_1 = arith.constant 0 : i32
    return %c0_i32, %c0_i32_0 : i32, i32
  }
  func.func @transform_15(%arg0: i32) -> (i32, i32) {
    %c0_i32 = arith.constant 0 : i32
    %c0_i32_0 = arith.constant 0 : i32
    %c0_i32_1 = arith.constant 0 : i32
    return %c0_i32, %c0_i32_0 : i32, i32
  }
  func.func @transform_16(%arg0: i32) -> (i32, i32, i32) {
    %c0_i32 = arith.constant 0 : i32
    %c0_i32_0 = arith.constant 0 : i32
    %c0_i32_1 = arith.constant 0 : i32
    return %arg0, %c0_i32, %c0_i32_0 : i32, i32, i32
  }
  func.func @transform_17(%arg0: i32) -> (i32, i32, i32) {
    %c0_i32 = arith.constant 0 : i32
    %c0_i32_0 = arith.constant 0 : i32
    %c0_i32_1 = arith.constant 0 : i32
    return %arg0, %c0_i32, %c0_i32_0 : i32, i32, i32
  }
}

</mosaic_0001>

<bundles_post_ra>
// kernel: tpu_custom_call.1
= control target key start
LH: loop header
LB: loop body
LE: loop exit
PB: predicated region body
PF: predicated region fallthrough
CT: control target
= control target key end

     0   :  { %s2573_s0 = inlined_call_operand.vmem [shape: f32[1,16,4], index: 0, kind: input, shape index: {}]   ;;  %s2574_s1 = inlined_call_operand.hbm [shape: f32[1,16,16], index: 1, kind: input, shape index: {}]   ;;  %s2575_s2 = inlined_call_operand.vmem [shape: f32[1,4], index: 2, kind: input, shape index: {}]   ;;  %s2576_s3 = inlined_call_operand.hbm [shape: f32[4,33], index: 3, kind: input, shape index: {}]   ;;  %s2577_s4 = inlined_call_operand.hbm [shape: f32[4,32], index: 4, kind: input, shape index: {}]   ;;  %s2578_s5 = inlined_call_operand.hbm [shape: f32[1,32], index: 5, kind: input, shape index: {}]   ;;  %s2579_s6 = inlined_call_operand.hbm [shape: f32[1,32], index: 6, kind: input, shape index: {}]   ;;  %s2580_s7 = inlined_call_operand.vmem [shape: f32[32,33], index: 7, kind: input, shape index: {}]   ;;  %s2581_s8 = inlined_call_operand.hbm [shape: f32[32,32], index: 8, kind: input, shape index: {}]   ;;  %s2582_s9 = inlined_call_operand.hbm [shape: f32[1,32], index: 9, kind: input, shape index: {}]   ;;  %s2583_s10 = inlined_call_operand.hbm [shape: f32[1,32], index: 10, kind: input, shape index: {}]   ;;  %s2584_s11 = inlined_call_operand.hbm [shape: f32[32,33], index: 11, kind: input, shape index: {}]   ;;  %s2585_s12 = inlined_call_operand.vmem [shape: f32[32,32], index: 12, kind: input, shape index: {}]   ;;  %s2586_s13 = inlined_call_operand.vmem [shape: f32[1,32], index: 13, kind: input, shape index: {}]   ;;  %s2587_s14 = inlined_call_operand.vmem [shape: f32[2,32], index: 14, kind: input, shape index: {}]   ;;  %s2588_s15 = inlined_call_operand.vmem [shape: f32[1,2], index: 15, kind: input, shape index: {}]   ;;  %s2589_s16 = inlined_call_operand.hbm [shape: f32[1,1,16], index: 16, kind: output, shape index: {0}]   ;;  %s2590_s17 = inlined_call_operand.hbm [shape: f32[1,1,2], index: 17, kind: output, shape index: {1}]  }
   0x1   :  { %2593 = sst [smem:[#allocation27_spill]] %s2573_s0 }
   0x2   :  { %2594 = sst [smem:[#allocation28_spill]] %s2574_s1 }
   0x3   :  { %23 = vsyncpa [#allocation3], 0 }
   0x4   :  { %24 = vsyncpa [#allocation6], 0 }
   0x5   :  { %25 = vsyncpa [#allocation9], 0 }
   0x6   :  { %26 = vsyncpa [#allocation12], 0 }
   0x7   :  { %27 = vsyncpa [#allocation15], 0 }
   0x8   :  { %28 = vsyncpa [#allocation4], 0 }
   0x9   :  { %29 = vsyncpa [#allocation19], 0  ;;  %s2139_s24 = smov [#allocation5]   ;;  %s2140_s26 = smov [#allocation8]  }
   0xa   :  { %s52_s25 = sshll.u32 %s2139_s24, 4  ;;  %s72_s27 = sshll.u32 %s2140_s26, 4  ;;  %s53_s25 = int_to_ptr.vmem [resolvable:$true] %s52_s25  ;;  %s73_s27 = int_to_ptr.vmem [resolvable:$true] %s72_s27 }
   0xb   :  { %s1883_s0 = scalar_lea.hbm %s2576_s3, 64 }
   0xc   :  { %p1884_p0 = scmp.ne.s32.totalorder %s2576_s3, %s1883_s0  ;;  %p1887_p1 = scmp.lt.u32.totalorder %s1883_s0, %s2576_s3 }
   0xe   :  { %p1889_p2 = pnand %p1887_p1, %p1884_p0 }
  0x10   :  { %1892 = shalt.err (!%p1889_p2)
}
  0x11   :  { %s1893_s20 = scalar_lea.vmem %s53_s25, 64  ;;  %p1898_p4 = scmp.lt.s32.totalorder %s53_s25, %s53_s25 }
  0x12   :  { %p1894_p3 = scmp.ne.s32.totalorder %s53_s25, %s1893_s20  ;;  %p1899_p5 = scmp.lt.s32.totalorder %s1893_s20, %s1893_s20 }
  0x14   :  { %p1900_p6 = por %p1899_p5, %p1898_p4 }
  0x16   :  { %p1901_p7 = pnand %p1900_p6, %p1894_p3 }
  0x18   :  { %1904 = shalt.err (!%p1901_p7)
}
  0x19   :  { %55 = dma.hbm_to_vmem [thread:$0]  %s2576_s3, 64, %s53_s25, [#allocation6]  }
  0x1a   :  { %s1905_s26 = scalar_lea.hbm %s2578_s5, 16 }
  0x1b   :  { %p1906_p8 = scmp.ne.s32.totalorder %s2578_s5, %s1905_s26  ;;  %p1909_p9 = scmp.lt.u32.totalorder %s1905_s26, %s2578_s5 }
  0x1d   :  { %p1911_p10 = pnand %p1909_p9, %p1906_p8 }
  0x1f   :  { %1914 = shalt.err (!%p1911_p10)
}
  0x20   :  { %s1915_s18 = scalar_lea.vmem %s73_s27, 16  ;;  %s1919_s19 = scalar_lea.vmem %s73_s27, 32 }
  0x21   :  { %p1916_p11 = scmp.ne.s32.totalorder %s73_s27, %s1915_s18  ;;  %p1920_p12 = scmp.lt.s32.totalorder %s73_s27, %s73_s27 }
  0x22   :  { %p1921_p13 = scmp.lt.s32.totalorder %s1919_s19, %s1915_s18 }
  0x24   :  { %p1922_p0 = por %p1921_p13, %p1920_p12 }
  0x26   :  { %p1923_p1 = pnand %p1922_p0, %p1916_p11 }
  0x28   :  { %1926 = shalt.err (!%p1923_p1)
}
  0x29   :  { %75 = dma.hbm_to_vmem [thread:$0]  %s2578_s5, 16, %s73_s27, [#allocation9]  }
  0x2a   :  { %s2141_s1 = smov [#allocation11]   ;;  %s2142_s21 = smov [#allocation14]  }
  0x2b   :  { %s93_s20 = sshll.u32 %s2141_s1, 4  ;;  %s116_s22 = sshll.u32 %s2142_s21, 4  ;;  %s94_s20 = int_to_ptr.vmem [resolvable:$true] %s93_s20  ;;  %s2272_s22 = int_to_ptr.vmem [resolvable:$true] %s116_s22 }
  0x2c   :  { %s1927_s26 = scalar_lea.hbm %s2581_s8, 512 }
  0x2d   :  { %p1928_p2 = scmp.ne.s32.totalorder %s2581_s8, %s1927_s26  ;;  %p1931_p3 = scmp.lt.u32.totalorder %s1927_s26, %s2581_s8 }
  0x2f   :  { %p1933_p4 = pnand %p1931_p3, %p1928_p2 }
  0x31   :  { %1936 = shalt.err (!%p1933_p4)
}
  0x32   :  { %s1937_s5 = scalar_lea.vmem %s94_s20, 512  ;;  %p1942_p6 = scmp.lt.s32.totalorder %s94_s20, %s94_s20 }
  0x33   :  { %p1938_p5 = scmp.ne.s32.totalorder %s94_s20, %s1937_s5  ;;  %p1943_p7 = scmp.lt.s32.totalorder %s1937_s5, %s1937_s5 }
  0x35   :  { %p1944_p8 = por %p1943_p7, %p1942_p6 }
  0x37   :  { %p1945_p9 = pnand %p1944_p8, %p1938_p5 }
  0x39   :  { %1948 = shalt.err (!%p1945_p9)
}
  0x3a   :  { %s2143_s27 = smov 128   ;;  %s2144_s18 = smov 8  }
  0x3b   :  { %99 = dma.hbm_to_vmem [thread:$0]  %s2581_s8, 512, %s94_s20, [#allocation12], %s2143_s27, %s2143_s27, %s2144_s18  }
  0x3c   :  { %s1949_s21 = scalar_lea.hbm %s2583_s10, 16 }
  0x3d   :  { %p1950_p10 = scmp.ne.s32.totalorder %s2583_s10, %s1949_s21  ;;  %p1953_p11 = scmp.lt.u32.totalorder %s1949_s21, %s2583_s10 }
  0x3f   :  { %p1955_p12 = pnand %p1953_p11, %p1950_p10 }
  0x41   :  { %1958 = shalt.err (!%p1955_p12)
}
  0x42   :  { %s1959_s29 = scalar_lea.vmem %s2272_s22, 16  ;;  %s1963_s8 = scalar_lea.vmem %s2272_s22, 32 }
  0x43   :  { %p1960_p13 = scmp.ne.s32.totalorder %s2272_s22, %s1959_s29  ;;  %p1964_p0 = scmp.lt.s32.totalorder %s2272_s22, %s2272_s22 }
  0x44   :  { %p1965_p1 = scmp.lt.s32.totalorder %s1963_s8, %s1959_s29 }
  0x46   :  { %p1966_p2 = por %p1965_p1, %p1964_p0 }
  0x48   :  { %p1967_p3 = pnand %p1966_p2, %p1960_p13 }
  0x4a   :  { %1970 = shalt.err (!%p1967_p3)
}
  0x4b   :  { %119 = dma.hbm_to_vmem [thread:$0]  %s2583_s10, 16, %s2272_s22, [#allocation15]  }
  0x4c   :  { %s2145_s30 = smov [#allocation2]   ;;  %s2146_s19 = smov [#allocation7]  }
  0x4d   :  { %s37_s5 = sshll.u32 %s2145_s30, 4  ;;  %s62_s3 = sshll.u32 %s2146_s19, 4  ;;  %s38_s5 = int_to_ptr.vmem [resolvable:$true] %s37_s5  ;;  %s63_s3 = int_to_ptr.vmem [resolvable:$true] %s62_s3 }
  0x4e   :  { %s2595_s21 = sld [smem:[#allocation28_spill]] }
  0x54   :  { %s1971_s23 = scalar_lea.hbm %s2595_s21, 256 }
  0x55   :  { %p1972_p4 = scmp.ne.s32.totalorder %s2595_s21, %s1971_s23  ;;  %p1975_p5 = scmp.lt.u32.totalorder %s1971_s23, %s2595_s21 }
  0x57   :  { %p1977_p6 = pnand %p1975_p5, %p1972_p4 }
  0x59   :  { %1980 = shalt.err (!%p1977_p6)
}
  0x5a   :  { %s1981_s10 = scalar_lea.vmem %s38_s5, 256  ;;  %p1986_p8 = scmp.lt.s32.totalorder %s38_s5, %s38_s5 }
  0x5b   :  { %p1982_p7 = scmp.ne.s32.totalorder %s38_s5, %s1981_s10  ;;  %p1987_p9 = scmp.lt.s32.totalorder %s1981_s10, %s1981_s10 }
  0x5d   :  { %p1988_p10 = por %p1987_p9, %p1986_p8 }
  0x5f   :  { %p1989_p11 = pnand %p1988_p10, %p1982_p7 }
  0x61   :  { %1992 = shalt.err (!%p1989_p11)
}
  0x62   :  { %43 = dma.hbm_to_vmem [thread:$0]  %s2595_s21, 256, %s38_s5, [#allocation3], %s2143_s27, %s2143_s27, %s2144_s18  }
  0x63   :  { %s1993_s30 = scalar_lea.hbm %s2577_s4, 64 }
  0x64   :  { %p1994_p12 = scmp.ne.s32.totalorder %s2577_s4, %s1993_s30  ;;  %p1997_p13 = scmp.lt.u32.totalorder %s1993_s30, %s2577_s4 }
  0x66   :  { %p1999_p0 = pnand %p1997_p13, %p1994_p12 }
  0x68   :  { %2002 = shalt.err (!%p1999_p0)
}
  0x69   :  { %s2003_s24 = scalar_lea.vmem %s63_s3, 64  ;;  %p2008_p2 = scmp.lt.s32.totalorder %s63_s3, %s63_s3 }
  0x6a   :  { %p2004_p1 = scmp.ne.s32.totalorder %s63_s3, %s2003_s24  ;;  %p2009_p3 = scmp.lt.s32.totalorder %s2003_s24, %s2003_s24 }
  0x6c   :  { %p2010_p4 = por %p2009_p3, %p2008_p2 }
  0x6e   :  { %p2011_p5 = pnand %p2010_p4, %p2004_p1 }
  0x70   :  { %2014 = shalt.err (!%p2011_p5)
}
  0x71   :  { %65 = dma.hbm_to_vmem [thread:$0]  %s2577_s4, 64, %s63_s3, [#allocation6]  }
  0x72   :  { %s2147_s26 = smov [#allocation10]   ;;  %s2148_s29 = smov [#allocation13]  }
  0x73   :  { %s82_s28 = sshll.u32 %s2147_s26, 4  ;;  %s106_s10 = sshll.u32 %s2148_s29, 4  ;;  %s83_s28 = int_to_ptr.vmem [resolvable:$true] %s82_s28  ;;  %s107_s10 = int_to_ptr.vmem [resolvable:$true] %s106_s10 }
  0x74   :  { %s2015_s20 = scalar_lea.hbm %s2579_s6, 16 }
  0x75   :  { %p2016_p6 = scmp.ne.s32.totalorder %s2579_s6, %s2015_s20  ;;  %p2019_p7 = scmp.lt.u32.totalorder %s2015_s20, %s2579_s6 }
  0x77   :  { %p2021_p8 = pnand %p2019_p7, %p2016_p6 }
  0x79   :  { %2024 = shalt.err (!%p2021_p8)
}
  0x7a   :  { %s2025_s4 = scalar_lea.vmem %s83_s28, 16  ;;  %s2029_s3 = scalar_lea.vmem %s83_s28, 32 }
  0x7b   :  { %p2026_p9 = scmp.ne.s32.totalorder %s83_s28, %s2025_s4  ;;  %p2030_p10 = scmp.lt.s32.totalorder %s83_s28, %s83_s28 }
  0x7c   :  { %p2031_p11 = scmp.lt.s32.totalorder %s2029_s3, %s2025_s4 }
  0x7e   :  { %p2032_p12 = por %p2031_p11, %p2030_p10 }
  0x80   :  { %p2033_p13 = pnand %p2032_p12, %p2026_p9 }
  0x82   :  { %2036 = shalt.err (!%p2033_p13)
}
  0x83   :  { %85 = dma.hbm_to_vmem [thread:$0]  %s2579_s6, 16, %s83_s28, [#allocation9]  }
  0x84   :  { %s2037_s21 = scalar_lea.hbm %s2582_s9, 16 }
  0x85   :  { %p2038_p0 = scmp.ne.s32.totalorder %s2582_s9, %s2037_s21  ;;  %p2041_p1 = scmp.lt.u32.totalorder %s2037_s21, %s2582_s9 }
  0x87   :  { %p2043_p2 = pnand %p2041_p1, %p2038_p0 }
  0x89   :  { %2046 = shalt.err (!%p2043_p2)
}
  0x8a   :  { %s2047_s20 = scalar_lea.vmem %s107_s10, 16  ;;  %s2051_s0 = scalar_lea.vmem %s107_s10, 32 }
  0x8b   :  { %p2048_p3 = scmp.ne.s32.totalorder %s107_s10, %s2047_s20  ;;  %p2052_p4 = scmp.lt.s32.totalorder %s107_s10, %s107_s10 }
  0x8c   :  { %p2053_p5 = scmp.lt.s32.totalorder %s2051_s0, %s2047_s20 }
  0x8e   :  { %p2054_p6 = por %p2053_p5, %p2052_p4 }
  0x90   :  { %p2055_p7 = pnand %p2054_p6, %p2048_p3 }
  0x92   :  { %2058 = shalt.err (!%p2055_p7)
}
  0x93   :  { %109 = dma.hbm_to_vmem [thread:$0]  %s2582_s9, 16, %s107_s10, [#allocation12]  }
  0x94   :  { %s2149_s30 = smov [#allocation16]   ;;  %s2059_s3 = scalar_lea.hbm %s2584_s11, 512 }
  0x95   :  { %s125_s19 = sshll.u32 %s2149_s30, 4  ;;  %p2060_p8 = scmp.ne.s32.totalorder %s2584_s11, %s2059_s3  ;;  %s126_s19 = int_to_ptr.vmem [resolvable:$true] %s125_s19 }
  0x96   :  { %p2063_p9 = scmp.lt.u32.totalorder %s2059_s3, %s2584_s11 }
  0x98   :  { %p2065_p10 = pnand %p2063_p9, %p2060_p8 }
  0x9a   :  { %2068 = shalt.err (!%p2065_p10)
}
  0x9b   :  { %s2069_s21 = scalar_lea.vmem %s126_s19, 512  ;;  %p2074_p12 = scmp.lt.s32.totalorder %s126_s19, %s126_s19 }
  0x9c   :  { %p2070_p11 = scmp.ne.s32.totalorder %s126_s19, %s2069_s21  ;;  %p2075_p13 = scmp.lt.s32.totalorder %s2069_s21, %s2069_s21 }
  0x9e   :  { %p2076_p0 = por %p2075_p13, %p2074_p12 }
  0xa0   :  { %p2077_p1 = pnand %p2076_p0, %p2070_p11 }
  0xa2   :  { %2080 = shalt.err (!%p2077_p1)
}
  0xa3   :  { %131 = dma.hbm_to_vmem [thread:$0]  %s2584_s11, 512, %s126_s19, [#allocation15], %s2143_s27, %s2143_s27, %s2144_s18  }
  0xa4   :  { %2125 = dma.done.wait [#allocation3], 256  }
  0xa5   :  { %2126 = vsyncadd [#allocation3], 4294967040 }
  0xa6   :  { %2127 = dma.done.wait [#allocation6], 128  }
  0xa7   :  { %2128 = vsyncadd [#allocation6], 4294967168 }
  0xa8   :  { %2129 = dma.done.wait [#allocation9], 32  }
  0xa9   :  { %2130 = vsyncadd [#allocation9], 4294967264 }
  0xaa   :  { %2131 = dma.done.wait [#allocation12], 528  }
  0xab   :  { %2132 = vsyncadd [#allocation12], 4294966768 }
  0xac   :  { %2133 = dma.done.wait [#allocation15], 528  }
  0xad   :  { %2134 = vsyncadd [#allocation15], 4294966768  ;;  %v2150_v0 = vmov 0.0|0.0   ;;  %vm2151_vm0 = vmmov 0   ;;  %v2152_v1 = vmov 0.0   ;;  %vm182_vm1 = vcmask 1043456  }
  0xae   :  { %1775 = vmatprep.subr.bf16.mxu1 %v2150_v0  ;;  %1676 = vmatprep.mubr.msk.f32.mxu1 %vm2151_vm0, %v2152_v1  ;;  %vm175_vm2 = vcmask 31744   ;;  %v172_v2 = vld [vmem:[#allocation5] sm:$0xf]  ;;  %s2596_s18 = sld [smem:[#allocation27_spill]]  ;;  %v171_v6 = vld [vmem:[%s2575_s2] sm:$0x1]  ;;  %v344_v12 = vlaneseq }
  0xaf   :  { %vm1777_vm3 = vmpackc.low %vm175_vm2, %vm175_vm2  ;;  %1667 = vmatprep.subr.msk.mxu0 %vm182_vm1, %v172_v2  ;;  %v2153_v7 = vmov 32   ;;  %v2405_v17 = vld [vmem:[#allocation2] sm:$0xff]  ;;  %vm360_vm6 = vcmask 130048   ;;  %v2408_v21 = vld [vmem:[#allocation2 + $0x8] sm:$0xff]  ;;  %vm576_vm11 = vcmask 261120  }
  0xb0   :  { %1668 = vmatpush3.msk.msra.mxu0 %vm182_vm1, %v172_v2  ;;  %1854 = vset.pattern.permute.xlu0 %v2153_v7  ;;  %v2399_v13 = vshrl.u32 %v344_v12, 7  ;;  %vm356_vm5 = vcmp.gt.f32.partialorder %v2405_v17, 0.0  ;;  %vm357_vm8 = vcmp.gt.f32.partialorder %v2408_v21, 0.0  ;;  %v173_v42 = vld [vmem:[#allocation7] sm:$0xf]  ;;  %v567_v53 = vld [vmem:[%s2580_s7] sm:$0xff]  ;;  %vm2446_vm12 = vmpackc.low %vm576_vm11, %vm576_vm11 }
  0xb1   :  { %1855 = vset.pattern.permute.xlu1 %v2153_v7  ;;  %v568_v54 = vld [vmem:[%s2580_s7 + $0x8] sm:$0xff]  ;;  %v569_v56 = vld [vmem:[%s2580_s7 + $0x10] sm:$0xff]  ;;  %v570_v57 = vld [vmem:[%s2580_s7 + $0x18] sm:$0xff] }
  0xb2   :  { %v2402_v14 = vsub.s32 0, %v2399_v13  ;;  %v1783_v55 = vpack.c.bf16 %v568_v54, %v567_v53  ;;  %v1787_v58 = vpack.c.bf16 %v570_v57, %v569_v56  ;;  %v1585_v59 = vld [vmem:[#allocation8] ss:$0 sm:$0xff] }
  0xb4   :  { %v167_v3 = vld [vmem:[%s2596_s18] sm:$0xff]  ;;  %v168_v4 = vld [vmem:[%s2596_s18 + $0x8] sm:$0xff] }
  0xb5   :  { %1669 = vmatprep.mubr.msk.f32.mxu0 %vm175_vm2, %v167_v3  ;;  %v1776_v5 = vpack.c.bf16 %v168_v4, %v167_v3 }
  0xb6   :  { %1670 = vmatmul.mubr.msk.f32.vlgmr.msra.gmra.mrb[0].mxu0 %vm175_vm2, %v168_v4 }
  0xb7   :  { %1778 = vmatpush3.bf16.xpose.msk.msra.mxu1 %vm1777_vm3, %v1776_v5  ;;  %1780 = vmatprep.subr.bf16.mxu0 %v1776_v5 }
  0xb8   :  { %1782 = vmatpush3.bf16.msra.mxu0 %v1776_v5  ;;  %1784 = vmatprep.subr.bf16.mxu1 %v1783_v55 }
  0xb9   :  { %1686 = vmatprep.subr.msk.mxu0 %vm182_vm1, %v173_v42 }
  0xbe   :  { %1677 = vmatmul.mubr.msk.f32.vlgmr.msra.gmra.mrb[0].mxu1 %vm175_vm2, %v171_v6 }
  0xbf   :  { %1786 = vmatpush3.bf16.msra.mxu1 %v1783_v55 }
  0xc0   :  { %1788 = vmatprep.subr.bf16.mxu1 %v1787_v58 }
  0xc3   :  { %1790 = vmatpush3.bf16.msra.mxu1 %v1787_v58 }
 0x189   :  { %v2392_v8 = vpop.f32.mrb[0].mxu0 }
 0x18a   :  { %v2394_v9 = vpop.f32.mrb[1].mxu0 }
 0x18b   :  { %336 = vperm.xlu0 %1854, %v2394_v9  }
 0x18f   :  { %341 = vperm.xlu0 %1854, %v2392_v8  }
 0x191   :  { %v330_v10 = vpop.f32.mrb[0].mxu1 }
 0x192   :  { %v1678_v11 = vpop.f32.mrb[1].mxu1  ;;  %v347_v15 = vrot.slane %v330_v10, %v2402_v14 }
 0x20a   :  { %v337_v16 = vpop.permute.xlu0 %336 }
 0x20b   :  { %v348_v18 = vadd.f32 %v347_v15, %v337_v16 }
 0x20d   :  { %v352_v19 = vmul.f32 0.01, %v348_v18  ;;  %vm350_vm4 = vcmp.ge.f32.partialorder %v348_v18, 0.0 }
 0x20e   :  { %v342_v20 = vpop.permute.xlu0 %341 }
 0x20f   :  { %v349_v22 = vadd.f32 %v347_v15, %v342_v20  ;;  %v354_v23 = vsel %vm350_vm4, %v348_v18, %v352_v19 }
 0x210   :  { %v358_v24 = vsel %vm356_vm5, %v354_v23, -1e+30 }
 0x211   :  { %v353_v25 = vmul.f32 0.01, %v349_v22  ;;  %v361_v26 = vsel %vm360_vm6, %v358_v24, -inf  ;;  %vm351_vm7 = vcmp.ge.f32.partialorder %v349_v22, 0.0 }
 0x212   :  { %362 = vmax.xlane.f32.xlu1 %v361_v26 }
 0x213   :  { %v355_v27 = vsel %vm351_vm7, %v349_v22, %v353_v25 }
 0x214   :  { %v359_v28 = vsel %vm357_vm8, %v355_v27, -1e+30 }
 0x215   :  { %v364_v29 = vsel %vm360_vm6, %v359_v28, -inf }
 0x216   :  { %365 = vmax.xlane.f32.xlu1 %v364_v29 }
 0x29f   :  { %v363_v30 = vpop.xlane.xlu1 %362 }
 0x2a0   :  { %v367_v31 = vsub.f32 %v358_v24, %v363_v30 }
 0x2a2   :  { %v369_v32 = vmul.f32 1.442695, %v367_v31 }
 0x2a3   :  { %v366_v33 = vpop.xlane.xlu1 %365 }
 0x2a4   :  { %1859 = vpow2.f32 %v369_v32  ;;  %v368_v34 = vsub.f32 %v359_v28, %v366_v33 }
 0x2a6   :  { %v371_v35 = vmul.f32 1.442695, %v368_v34 }
 0x2a8   :  { %1861 = vpow2.f32 %v371_v35 }
 0x2ae   :  { %v1860_v36 = vpop.eup %1859 }
 0x2af   :  { %v373_v37 = vmul.f32 %v1860_v36, %v2405_v17 }
 0x2b1   :  { %v375_v38 = vsel %vm360_vm6, %v373_v37, 0.0 }
 0x2b2   :  { %v1862_v39 = vpop.eup %1861  ;;  %376 = vadd.xlane.f32.xlu0 %v375_v38 }
 0x2b3   :  { %v374_v40 = vmul.f32 %v1862_v39, %v2408_v21 }
 0x2b5   :  { %v378_v41 = vsel %vm360_vm6, %v374_v40, 0.0 }
 0x2b6   :  { %379 = vadd.xlane.f32.xlu1 %v378_v41 }
 0x33f   :  { %v377_v43 = vpop.xlane.xlu0 %376 }
 0x340   :  { %vm381_vm9 = vcmp.gt.f32.partialorder %v377_v43, 0.0 }
 0x341   :  { %v383_v44 = vsel %vm381_vm9, %v377_v43, 1.0  ;;  %v571_v43 = vld [vmem:[#allocation11] sm:$0xff] }
 0x342   :  { %1863 = vrcp.f32 %v383_v44  ;;  %v572_v44 = vld [vmem:[#allocation11 + $0x8] sm:$0xff] }
 0x343   :  { %v380_v45 = vpop.xlane.xlu1 %379 }
 0x344   :  { %vm382_vm10 = vcmp.gt.f32.partialorder %v380_v45, 0.0 }
 0x345   :  { %v384_v46 = vsel %vm382_vm10, %v380_v45, 1.0  ;;  %v573_v45 = vld [vmem:[#allocation11 + $0x10] sm:$0xff] }
 0x346   :  { %1865 = vrcp.f32 %v384_v46  ;;  %v1799_v46 = vpack.c.bf16 %v572_v44, %v571_v43 }
 0x34c   :  { %v1864_v47 = vpop.eup %1863 }
 0x34d   :  { %v386_v48 = vmul.f32 %v1864_v47, %v373_v37  ;;  %v574_v47 = vld [vmem:[#allocation11 + $0x18] sm:$0xff] }
 0x34f   :  { %1683 = vmatprep.mubr.msk.f32.mxu0 %vm360_vm6, %v386_v48  ;;  %v1803_v48 = vpack.c.bf16 %v574_v47, %v573_v45 }
 0x350   :  { %v1866_v49 = vpop.eup %1865 }
 0x351   :  { %v388_v50 = vmul.f32 %v1866_v49, %v374_v40 }
 0x353   :  { %1684 = vmatmul.mubr.msk.f32.vlgmr.msra.gmra.mrb[2].mxu0 %vm360_vm6, %v388_v50 }
 0x354   :  { %1687 = vmatpush3.msk.msra.mxu0 %vm182_vm1, %v173_v42 }
 0x355   :  { %1791 = vmatprep.subr.bf16.mxu0 %v2150_v0 }
 0x426   :  { %v1685_v51 = vpop.f32.mrb[2].mxu0 }
 0x427   :  { %v461_v52 = vpop.f32.mrb[3].mxu0 }
 0x428   :  { %1688 = vmatprep.mubr.msk.f32.mxu0 %vm175_vm2, %v461_v52 }
 0x429   :  { %1689 = vmatmul.mubr.msk.f32.vlgmr.msra.gmra.mrb[4].mxu0 %vm175_vm2, %v1685_v51 }
 0x42a   :  { %1706 = vmatprep.mubr.msk.f32.mxu0 %vm2151_vm0, %v2152_v1 }
 0x4fc   :  { %v1690_v60 = vpop.f32.mrb[4].mxu0 }
 0x4fd   :  { %v555_v61 = vadd.f32 %v1690_v60, %v2392_v8  ;;  %v545_v62 = vpop.f32.mrb[5].mxu0  ;;  %v566_v8 = vld [vmem:[#allocation10] sm:$0x1]  ;;  %v959_v60 = vld [vmem:[#allocation16 + $0x8] sm:$0xff] }
 0x4fe   :  { %v554_v63 = vadd.f32 %v545_v62, %v2394_v9  ;;  %v960_v62 = vld [vmem:[#allocation16 + $0x10] sm:$0xff] }
 0x4ff   :  { %v563_v2 = vadd.f32 %v1585_v59, %v555_v61 }
 0x500   :  { %v562_v3 = vadd.f32 %v1585_v59, %v554_v63  ;;  %v958_v59 = vld [vmem:[#allocation16] sm:$0xff]  ;;  %v961_v63 = vld [vmem:[#allocation16 + $0x18] sm:$0xff] }
 0x501   :  { %v565_v4 = vmax.f32 %v563_v2, 0.0  ;;  %v1807_v61 = vpack.c.bf16 %v959_v60, %v958_v59  ;;  %v1811_v2 = vpack.c.bf16 %v961_v63, %v960_v62  ;;  %v1427_v62 = vld [vmem:[%s2588_s15] sm:$0x1]  ;;  %v2154_v63 = vmov 0  }
 0x502   :  { %v564_v5 = vmax.f32 %v562_v3, 0.0  ;;  %v1595_v3 = vld [vmem:[#allocation13] ss:$0 sm:$0xff] }
 0x504   :  { %v1792_v7 = vpack.c.bf16 %v565_v4, %v564_v5  ;;  %1699 = vmatprep.mubr.msk.f32.mxu1 %vm576_vm11, %v564_v5 }
 0x505   :  { %1700 = vmatmul.mubr.msk.f32.vlgmr.msra.gmra.mrb[2].mxu1 %vm576_vm11, %v565_v4 }
 0x506   :  { %1794 = vmatpush3.bf16.xpose.msk.msra.mxu0 %vm2446_vm12, %v1792_v7  ;;  %1796 = vmatprep.subr.bf16.mxu1 %v1792_v7 }
 0x507   :  { %1798 = vmatpush3.bf16.msra.mxu1 %v1792_v7  ;;  %1800 = vmatprep.subr.bf16.mxu0 %v1799_v46 }
 0x508   :  { %1808 = vmatprep.subr.bf16.mxu1 %v1807_v61 }
 0x50d   :  { %1707 = vmatmul.mubr.msk.f32.vlgmr.msra.gmra.mrb[6].mxu0 %vm576_vm11, %v566_v8 }
 0x50e   :  { %1802 = vmatpush3.bf16.msra.mxu0 %v1799_v46 }
 0x50f   :  { %1804 = vmatprep.subr.bf16.mxu0 %v1803_v48 }
 0x512   :  { %1806 = vmatpush3.bf16.msra.mxu0 %v1803_v48  ;;  %v962_v48 = vld [vmem:[%s2585_s12] sm:$0xff] }
 0x513   :  { %1815 = vmatprep.subr.bf16.mxu0 %v2150_v0 }
 0x5d8   :  { %v2455_v9 = vpop.f32.mrb[2].mxu1 }
 0x5d9   :  { %v2457_v10 = vpop.f32.mrb[3].mxu1 }
 0x5da   :  { %733 = vperm.xlu1 %1855, %v2457_v10  }
 0x5de   :  { %738 = vperm.xlu1 %1855, %v2455_v9  }
 0x5e0   :  { %v727_v11 = vpop.f32.mrb[6].mxu0 }
 0x5e1   :  { %v1708_v15 = vpop.f32.mrb[7].mxu0  ;;  %v744_v16 = vrot.slane %v727_v11, %v2402_v14 }
 0x659   :  { %v734_v18 = vpop.permute.xlu1 %733 }
 0x65a   :  { %v745_v19 = vadd.f32 %v744_v16, %v734_v18 }
 0x65c   :  { %v749_v20 = vmul.f32 0.01, %v745_v19  ;;  %vm747_vm13 = vcmp.ge.f32.partialorder %v745_v19, 0.0 }
 0x65d   :  { %v739_v22 = vpop.permute.xlu1 %738 }
 0x65e   :  { %v746_v23 = vadd.f32 %v744_v16, %v739_v22  ;;  %v751_v24 = vsel %vm747_vm13, %v745_v19, %v749_v20 }
 0x65f   :  { %v753_v25 = vsel %vm356_vm5, %v751_v24, -1e+30 }
 0x660   :  { %v750_v26 = vmul.f32 0.01, %v746_v23  ;;  %v755_v27 = vsel %vm360_vm6, %v753_v25, -inf  ;;  %vm748_vm14 = vcmp.ge.f32.partialorder %v746_v23, 0.0 }
 0x661   :  { %756 = vmax.xlane.f32.xlu1 %v755_v27 }
 0x662   :  { %v752_v28 = vsel %vm748_vm14, %v746_v23, %v750_v26 }
 0x663   :  { %v754_v29 = vsel %vm357_vm8, %v752_v28, -1e+30 }
 0x664   :  { %v758_v30 = vsel %vm360_vm6, %v754_v29, -inf }
 0x665   :  { %759 = vmax.xlane.f32.xlu0 %v758_v30 }
 0x6ee   :  { %v757_v31 = vpop.xlane.xlu1 %756 }
 0x6ef   :  { %v761_v32 = vsub.f32 %v753_v25, %v757_v31 }
 0x6f1   :  { %v763_v33 = vmul.f32 1.442695, %v761_v32 }
 0x6f2   :  { %v760_v34 = vpop.xlane.xlu0 %759 }
 0x6f3   :  { %1867 = vpow2.f32 %v763_v33  ;;  %v762_v35 = vsub.f32 %v754_v29, %v760_v34 }
 0x6f5   :  { %v765_v36 = vmul.f32 1.442695, %v762_v35 }
 0x6f7   :  { %1869 = vpow2.f32 %v765_v36 }
 0x6fd   :  { %v1868_v37 = vpop.eup %1867 }
 0x6fe   :  { %v767_v38 = vmul.f32 %v1868_v37, %v2405_v17 }
 0x700   :  { %v769_v39 = vsel %vm360_vm6, %v767_v38, 0.0 }
 0x701   :  { %v1870_v40 = vpop.eup %1869  ;;  %770 = vadd.xlane.f32.xlu0 %v769_v39 }
 0x702   :  { %v768_v41 = vmul.f32 %v1870_v40, %v2408_v21 }
 0x704   :  { %v772_v42 = vsel %vm360_vm6, %v768_v41, 0.0 }
 0x705   :  { %773 = vadd.xlane.f32.xlu0 %v772_v42 }
 0x78e   :  { %v771_v49 = vpop.xlane.xlu0 %770 }
 0x78f   :  { %vm775_vm15 = vcmp.gt.f32.partialorder %v771_v49, 0.0 }
 0x790   :  { %v777_v50 = vsel %vm775_vm15, %v771_v49, 1.0  ;;  %v963_v49 = vld [vmem:[%s2585_s12 + $0x8] sm:$0xff] }
 0x791   :  { %1871 = vrcp.f32 %v777_v50  ;;  %v1823_v50 = vpack.c.bf16 %v963_v49, %v962_v48 }
 0x792   :  { %v774_v51 = vpop.xlane.xlu0 %773 }
 0x793   :  { %vm776_vm1 = vcmp.gt.f32.partialorder %v774_v51, 0.0 }
 0x794   :  { %v778_v52 = vsel %vm776_vm1, %v774_v51, 1.0 }
 0x795   :  { %1873 = vrcp.f32 %v778_v52 }
 0x79b   :  { %v1872_v53 = vpop.eup %1871 }
 0x79c   :  { %v780_v54 = vmul.f32 %v1872_v53, %v767_v38 }
 0x79e   :  { %1713 = vmatprep.mubr.msk.f32.mxu1 %vm360_vm6, %v780_v54 }
 0x79f   :  { %v1874_v55 = vpop.eup %1873 }
 0x7a0   :  { %v782_v56 = vmul.f32 %v1874_v55, %v768_v41  ;;  %v964_v55 = vld [vmem:[%s2585_s12 + $0x10] sm:$0xff] }
 0x7a2   :  { %1714 = vmatmul.mubr.msk.f32.vlgmr.msra.gmra.mrb[4].mxu1 %vm360_vm6, %v782_v56  ;;  %v965_v56 = vld [vmem:[%s2585_s12 + $0x18] sm:$0xff] }
 0x7a3   :  { %1810 = vmatpush3.bf16.msra.mxu1 %v1807_v61  ;;  %v1827_v59 = vpack.c.bf16 %v965_v56, %v964_v55 }
 0x7a4   :  { %1812 = vmatprep.subr.bf16.mxu1 %v1811_v2 }
 0x7a7   :  { %1814 = vmatpush3.bf16.msra.mxu1 %v1811_v2  ;;  %v1443_v2 = vand.u32 127, %v344_v12 }
 0x875   :  { %v1715_v57 = vpop.f32.mrb[4].mxu1 }
 0x876   :  { %v855_v58 = vpop.f32.mrb[5].mxu1 }
 0x877   :  { %1724 = vmatprep.mubr.msk.f32.mxu0 %vm576_vm11, %v855_v58 }
 0x878   :  { %1725 = vmatmul.mubr.msk.f32.vlgmr.msra.gmra.mrb[8].mxu0 %vm576_vm11, %v1715_v57 }
 0x879   :  { %1742 = vmatprep.mubr.msk.f32.mxu0 %vm2151_vm0, %v2152_v1 }
 0x94b   :  { %v1726_v4 = vpop.f32.mrb[8].mxu0 }
 0x94c   :  { %v946_v5 = vadd.f32 %v1726_v4, %v2455_v9  ;;  %v936_v7 = vpop.f32.mrb[9].mxu0  ;;  %v957_v9 = vld [vmem:[#allocation14] sm:$0x1] }
 0x94d   :  { %v945_v8 = vadd.f32 %v936_v7, %v2457_v10  ;;  %v1605_v7 = vld [vmem:[%s2586_s13] ss:$0 sm:$0xff] }
 0x94e   :  { %v954_v11 = vadd.f32 %v1595_v3, %v946_v5 }
 0x94f   :  { %v953_v15 = vadd.f32 %v1595_v3, %v945_v8  ;;  %v1444_v3 = vmul.u32 8, %v2399_v13 }
 0x950   :  { %v956_v16 = vmax.f32 %v954_v11, 0.0 }
 0x951   :  { %v955_v18 = vmax.f32 %v953_v15, 0.0  ;;  %vm1445_vm7 = vcmp.ge.s32.totalorder %v1443_v2, %v1444_v3  ;;  %v1446_v4 = vadd.s32 8, %v1444_v3 }
 0x953   :  { %v1816_v19 = vpack.c.bf16 %v956_v16, %v955_v18  ;;  %1735 = vmatprep.mubr.msk.f32.mxu1 %vm576_vm11, %v955_v18 }
 0x954   :  { %1736 = vmatmul.mubr.msk.f32.vlgmr.msra.gmra.mrb[6].mxu1 %vm576_vm11, %v956_v16 }
 0x955   :  { %1818 = vmatpush3.bf16.xpose.msk.msra.mxu0 %vm2446_vm12, %v1816_v19  ;;  %1820 = vmatprep.subr.bf16.mxu1 %v1816_v19 }
 0x956   :  { %1822 = vmatpush3.bf16.msra.mxu1 %v1816_v19  ;;  %1831 = vmatprep.subr.bf16.mxu0 %v2150_v0 }
 0x957   :  { %1824 = vmatprep.subr.bf16.mxu1 %v1823_v50 }
 0x95c   :  { %1743 = vmatmul.mubr.msk.f32.vlgmr.msra.gmra.mrb[10].mxu0 %vm576_vm11, %v957_v9 }
 0x95d   :  { %1767 = vmatprep.mubr.msk.f32.mxu0 %vm2151_vm0, %v2152_v1 }
 0xa27   :  { %v2489_v10 = vpop.f32.mrb[6].mxu1 }
 0xa28   :  { %1128 = vperm.xlu1 %1855, %v2489_v10   ;;  %v2492_v20 = vpop.f32.mrb[7].mxu1 }
 0xa29   :  { %1123 = vperm.xlu0 %1854, %v2492_v20  }
 0xa2d   :  { %1856 = vset.pattern.permute.xlu0 %v2154_v63 }
 0xa2f   :  { %v1117_v22 = vpop.f32.mrb[10].mxu0 }
 0xa30   :  { %v1744_v23 = vpop.f32.mrb[11].mxu0  ;;  %v1134_v24 = vrot.slane %v1117_v22, %v2402_v14  ;;  %v2155_v22 = vmov 1  }
 0xa31   :  { %1857 = vset.pattern.permute.xlu1 %v2155_v22 }
 0xaa7   :  { %v1129_v25 = vpop.permute.xlu1 %1128 }
 0xaa8   :  { %v1136_v0 = vadd.f32 %v1134_v24, %v1129_v25  ;;  %v1124_v26 = vpop.permute.xlu0 %1123 }
 0xaa9   :  { %v1135_v27 = vadd.f32 %v1134_v24, %v1124_v26 }
 0xaaa   :  { %v1140_v28 = vmul.f32 0.01, %v1136_v0  ;;  %vm1138_vm2 = vcmp.ge.f32.partialorder %v1136_v0, 0.0 }
 0xaab   :  { %v1139_v29 = vmul.f32 0.01, %v1135_v27  ;;  %vm1137_vm3 = vcmp.ge.f32.partialorder %v1135_v27, 0.0 }
 0xaac   :  { %v1142_v30 = vsel %vm1138_vm2, %v1136_v0, %v1140_v28 }
 0xaad   :  { %v1144_v31 = vsel %vm357_vm8, %v1142_v30, -1e+30  ;;  %v1141_v32 = vsel %vm1137_vm3, %v1135_v27, %v1139_v29  ;;  %vm1447_vm8 = vcmp.lt.s32.totalorder %v1443_v2, %v1446_v4 }
 0xaae   :  { %v1148_v33 = vsel %vm360_vm6, %v1144_v31, -inf  ;;  %v1143_v34 = vsel %vm356_vm5, %v1141_v32, -1e+30  ;;  %vm1448_vm9 = vmand %vm1445_vm7, %vm1447_vm8 }
 0xaaf   :  { %1149 = vmax.xlane.f32.xlu1 %v1148_v33  ;;  %v1145_v35 = vsel %vm360_vm6, %v1143_v34, -inf  ;;  %v1449_v5 = vsel %vm1448_vm9, 1.0, %v2152_v1 }
 0xab0   :  { %1146 = vmax.xlane.f32.xlu0 %v1145_v35 }
 0xb3c   :  { %v1150_v36 = vpop.xlane.xlu1 %1149 }
 0xb3d   :  { %v1152_v37 = vsub.f32 %v1144_v31, %v1150_v36  ;;  %v1147_v38 = vpop.xlane.xlu0 %1146 }
 0xb3e   :  { %v1151_v39 = vsub.f32 %v1143_v34, %v1147_v38 }
 0xb3f   :  { %v1155_v40 = vmul.f32 1.442695, %v1152_v37 }
 0xb40   :  { %v1153_v41 = vmul.f32 1.442695, %v1151_v39 }
 0xb41   :  { %1875 = vpow2.f32 %v1155_v40 }
 0xb42   :  { %1877 = vpow2.f32 %v1153_v41 }
 0xb4b   :  { %v1876_v42 = vpop.eup %1875 }
 0xb4c   :  { %v1878_v43 = vpop.eup %1877  ;;  %v1158_v46 = vmul.f32 %v1876_v42, %v2408_v21 }
 0xb4d   :  { %v1157_v44 = vmul.f32 %v1878_v43, %v2405_v17 }
 0xb4e   :  { %v1162_v47 = vsel %vm360_vm6, %v1158_v46, 0.0 }
 0xb4f   :  { %v1159_v45 = vsel %vm360_vm6, %v1157_v44, 0.0 }
 0xb50   :  { %1160 = vadd.xlane.f32.xlu0 %v1159_v45 }
 0xb54   :  { %1163 = vadd.xlane.f32.xlu0 %v1162_v47 }
 0xb6a   :  { %1430 = vperm.xlu0 %1856, %v1427_v62  }
 0xb6e   :  { %1858 = vset.pattern.permute.xlu0 %v2155_v22 }
 0xbdd   :  { %v1161_v51 = vpop.xlane.xlu0 %1160 }
 0xbde   :  { %vm1165_vm4 = vcmp.gt.f32.partialorder %v1161_v51, 0.0 }
 0xbdf   :  { %v1167_v17 = vsel %vm1165_vm4, %v1161_v51, 1.0 }
 0xbe0   :  { %1879 = vrcp.f32 %v1167_v17 }
 0xbe1   :  { %v1164_v52 = vpop.xlane.xlu0 %1163 }
 0xbe2   :  { %vm1166_vm5 = vcmp.gt.f32.partialorder %v1164_v52, 0.0 }
 0xbe3   :  { %v1168_v21 = vsel %vm1166_vm5, %v1164_v52, 1.0 }
 0xbe4   :  { %1881 = vrcp.f32 %v1168_v21 }
 0xbea   :  { %v1880_v53 = vpop.eup %1879 }
 0xbeb   :  { %v1170_v54 = vmul.f32 %v1880_v53, %v1157_v44 }
 0xbed   :  { %1749 = vmatprep.mubr.msk.f32.mxu1 %vm360_vm6, %v1170_v54 }
 0xbee   :  { %v1882_v57 = vpop.eup %1881 }
 0xbef   :  { %v1172_v58 = vmul.f32 %v1882_v57, %v1158_v46 }
 0xbf1   :  { %1750 = vmatmul.mubr.msk.f32.vlgmr.msra.gmra.mrb[8].mxu1 %vm360_vm6, %v1172_v58 }
 0xbf2   :  { %1826 = vmatpush3.bf16.msra.mxu1 %v1823_v50 }
 0xbf3   :  { %1828 = vmatprep.subr.bf16.mxu1 %v1827_v59 }
 0xbf6   :  { %1830 = vmatpush3.bf16.msra.mxu1 %v1827_v59 }
 0xbf7   :  { %1770 = vmatprep.subr.mxu1 %v2152_v1 }
 0xcc4   :  { %v1751_v60 = vpop.f32.mrb[8].mxu1 }
 0xcc5   :  { %v1245_v61 = vpop.f32.mrb[9].mxu1 }
 0xcc6   :  { %1760 = vmatprep.mubr.msk.f32.mxu1 %vm576_vm11, %v1245_v61 }
 0xcc7   :  { %1761 = vmatmul.mubr.msk.f32.vlgmr.msra.gmra.mrb[10].mxu1 %vm576_vm11, %v1751_v60 }
 0xcc8   :  { %1772 = vmatprep.mubr.msk.f32.mxu1 %vm2151_vm0, %v2152_v1  ;;  %1771 = vmatpush3.xpose.msk.msra.mxu1 %vm360_vm6, %v1449_v5  ;;  %v1347_v1 = vld [vmem:[%s2587_s14] sm:$0x3]  ;;  %vm1438_vm0 = vcmask 122880   ;;  %s2156_s14 = smov [#allocation17]  }
 0xcc9   :  { %s1547_s29 = sshll.u32 %s2156_s14, 4  ;;  %s1548_s29 = int_to_ptr.vmem [resolvable:$true] %s1547_s29 }
 0xcca   :  { %s2081_s22 = scalar_lea.vmem %s1548_s29, 16  ;;  %p2086_p3 = scmp.lt.s32.totalorder %s1548_s29, %s1548_s29 }
 0xccb   :  { %p2082_p2 = scmp.ne.s32.totalorder %s1548_s29, %s2081_s22 }
 0xd9a   :  { %v1762_v8 = vpop.f32.mrb[10].mxu1 }
 0xd9b   :  { %v1336_v11 = vadd.f32 %v1762_v8, %v2489_v10  ;;  %v1326_v15 = vpop.f32.mrb[11].mxu1  ;;  %v1528_v10 = vld [vmem:[%s2588_s15] sm:$0x1]  ;;  %s2085_s15 = scalar_lea.vmem %s1548_s29, 32 }
 0xd9c   :  { %v1335_v12 = vadd.f32 %v1326_v15, %v2492_v20  ;;  %1531 = vperm.xlu1 %1857, %v1528_v10   ;;  %v1431_v20 = vpop.permute.xlu0 %1430  ;;  %p2087_p4 = scmp.lt.s32.totalorder %s2085_s15, %s2081_s22 }
 0xd9d   :  { %v1344_v16 = vadd.f32 %v1605_v7, %v1336_v11  ;;  %v1436_v23 = vrot.slane %v1431_v20, %v2402_v14 }
 0xd9e   :  { %v1343_v13 = vadd.f32 %v1605_v7, %v1335_v12  ;;  %p2088_p5 = por %p2087_p4, %p2086_p3 }
 0xd9f   :  { %v1346_v18 = vmax.f32 %v1344_v16, 0.0 }
 0xda0   :  { %v1345_v19 = vmax.f32 %v1343_v13, 0.0  ;;  %p2089_p6 = pnand %p2088_p5, %p2082_p2 }
 0xda2   :  { %v1832_v9 = vpack.c.bf16 %v1346_v18, %v1345_v19 }
 0xda4   :  { %1834 = vmatpush3.bf16.xpose.msk.msra.mxu0 %vm2446_vm12, %v1832_v9 }
 0xdab   :  { %1768 = vmatmul.mubr.msk.f32.vlgmr.msra.gmra.mrb[12].mxu0 %vm576_vm11, %v1347_v1 }
 0xe7e   :  { %v1423_v24 = vpop.f32.mrb[12].mxu0 }
 0xe7f   :  { %v1437_v6 = vadd.f32 %v1436_v23, %v1423_v24  ;;  %v1451_v25 = vrot.slane %v1423_v24, 1  ;;  %v1769_v0 = vpop.f32.mrb[13].mxu0 }
 0xe81   :  { %1773 = vmatmul.mubr.msk.f32.vlgmr.msra.gmra.mrb[12].mxu1 %vm360_vm6, %v1451_v25  ;;  %1439 = vst.msk [vmem:[#allocation17] sm:$0x1] %vm1438_vm0, %v1437_v6 }
 0xe82   :  { %2092 = shalt.err (!%p2089_p6)
}
 0xe83   :  { %s2093_s20 = scalar_lea.hbm %s2589_s16, 16 }
 0xe84   :  { %p2094_p7 = scmp.ne.s32.totalorder %s2589_s16, %s2093_s20  ;;  %p2097_p8 = scmp.lt.u32.totalorder %s2093_s20, %s2589_s16 }
 0xe86   :  { %p2099_p9 = pnand %p2097_p8, %p2094_p7 }
 0xe88   :  { %2102 = shalt.err (!%p2099_p9)
}
 0xe89   :  { %1550 = dma.vmem_to_hbm [thread:$0]  %s1548_s29, 16, %s2589_s16, [#allocation4]   ;;  %v1532_v26 = vpop.permute.xlu1 %1531  ;;  %vm1539_vm6 = vcmask 8192  }
 0xe8a   :  { %v1537_v27 = vrot.slane %v1532_v26, %v2402_v14  ;;  %s2157_s7 = smov [#allocation18]  }
 0xe8b   :  { %s1557_s4 = sshll.u32 %s2157_s7, 4  ;;  %s1558_s4 = int_to_ptr.vmem [resolvable:$true] %s1557_s4 }
 0xe8c   :  { %s2103_s3 = scalar_lea.vmem %s1558_s4, 16  ;;  %s2107_s1 = scalar_lea.vmem %s1558_s4, 32 }
 0xe8d   :  { %p2104_p10 = scmp.ne.s32.totalorder %s1558_s4, %s2103_s3  ;;  %p2108_p11 = scmp.lt.s32.totalorder %s1558_s4, %s1558_s4 }
 0xe8e   :  { %p2109_p12 = scmp.lt.s32.totalorder %s2107_s1, %s2103_s3 }
 0xe90   :  { %p2110_p13 = por %p2109_p12, %p2108_p11 }
 0xe92   :  { %p2111_p0 = pnand %p2110_p13, %p2104_p10 }
 0xf54   :  { %v1523_v28 = vpop.f32.mrb[12].mxu1 }
 0xf55   :  { %v1527_v29 = vmul.f32 0.125, %v1523_v28  ;;  %v1774_v30 = vpop.f32.mrb[13].mxu1 }
 0xf57   :  { %v1538_v31 = vadd.f32 %v1537_v27, %v1527_v29 }
 0xf59   :  { %1540 = vst.msk [vmem:[#allocation18] sm:$0x1] %vm1539_vm6, %v1538_v31 }
 0xf5a   :  { %2114 = shalt.err (!%p2111_p0)
}
 0xf5b   :  { %s2115_s24 = scalar_lea.hbm %s2590_s17, 16 }
 0xf5c   :  { %p2116_p1 = scmp.ne.s32.totalorder %s2590_s17, %s2115_s24  ;;  %p2119_p2 = scmp.lt.u32.totalorder %s2115_s24, %s2590_s17 }
 0xf5e   :  { %p2121_p3 = pnand %p2119_p2, %p2116_p1 }
 0xf60   :  { %2124 = shalt.err (!%p2121_p3)
}
 0xf61   :  { %1560 = dma.vmem_to_hbm [thread:$0]  %s1558_s4, 16, %s2590_s17, [#allocation19]  }
 0xf62   :  { %2135 = dma.done.wait [#allocation4], 16  }
 0xf63   :  { %2136 = vsyncadd [#allocation4], 4294967280 }
 0xf64   :  { %2137 = dma.done.wait [#allocation19], 16  }
 0xf65   :  { %2138 = vsyncadd [#allocation19], 4294967280 }
 0xf66   :  { %1567 = vsyncpa [#allocation3], 1 }
 0xf67   :  { %1568 = vsyncpa [#allocation6], 1 }
 0xf68   :  { %1569 = vsyncpa [#allocation9], 1 }
 0xf69   :  { %1570 = vsyncpa [#allocation12], 1 }
 0xf6a   :  { %1571 = vsyncpa [#allocation15], 1 }
 0xf6b   :  { %1572 = vsyncpa [#allocation4], 1 }
 0xf6c   :  { %1573 = vsyncpa [#allocation19], 1 }

</bundles_post_ra>
